<compile_context>
chip_gen: v7x
topology: tpu7x:2x2x1
jax: 0.10.0
libtpu: 0.0.40
codegen_flags: <defaults>
</compile_context>

<pallas_src>
import jax
import jax.numpy as jnp
from jax.experimental import pallas as pl
from jax.experimental.pallas import tpu as pltpu


def _make_lrtf_kernel(num_modalities, rank, out_dim):
    M = num_modalities
    D = out_dim

    def kernel(fw_ref, *refs):
        # refs = [x_0..x_{M-1}, W_0..W_{M-1}, b_0..b_{M-1}, fusion_bias, out]
        x_refs = refs[0:M]
        w_refs = refs[M:2 * M]
        b_refs = refs[2 * M:3 * M]
        fb_ref = refs[3 * M]
        out_ref = refs[3 * M + 1]

        # Per-modality low-rank projection on the MXU; fold the ones-column
        # contribution in as a per-rank bias row.  Rank-wise product on VPU.
        fused = None
        for m in range(M):
            z = jnp.dot(x_refs[m][...], w_refs[m][...],
                        preferred_element_type=jnp.float32)
            z = z + b_refs[m][...]                      # (1, rank*D) broadcast
            fused = z if fused is None else fused * z   # (TB, rank*D)

        # Final rank reduction: out[b, d] = sum_r w_r * fused[b, r*D + d] + bias.
        # fusion_weights live in SMEM -> cheap scalar reads; D is a multiple of
        # 128 in practice so the column chunks are lane-aligned slices.
        acc = fw_ref[0, 0] * fused[:, 0:D]
        for r in range(1, rank):
            acc = acc + fw_ref[0, r] * fused[:, r * D:(r + 1) * D]
        out_ref[...] = (acc + fb_ref[...]).astype(out_ref.dtype)

    return kernel


def low_rank_tensor_fusion(modalities, factors, fusion_weights, fusion_bias,
                           *, batch_tile=None, interpret=False):
    """Pallas equivalent of LowRankTensorFusion.forward (flatten=True path;
    already-2D modalities pass through the reshape unchanged, so flatten=False
    is covered too)."""
    flat = [jnp.reshape(m, (m.shape[0], -1)) for m in modalities]
    B = flat[0].shape[0]
    rank, _, D = factors[0].shape
    RD = rank * D
    M = len(flat)

    # ---- one-time parameter re-layout (wrapper glue, not per-tile work) ----
    #   factor[r, 0,  :] -> per-rank bias row  (the "ones" column)
    #   factor[r, 1:, :] -> weights, re-laid out as a single [F_m, rank*D]
    Ws, bs = [], []
    for f, x in zip(factors, flat):
        Fm = x.shape[1]
        assert f.shape == (rank, Fm + 1, D), (f.shape, Fm)
        bs.append(jnp.reshape(f[:, 0, :], (1, RD)).astype(jnp.float32))
        Ws.append(jnp.reshape(jnp.transpose(f[:, 1:, :], (1, 0, 2)),
                              (Fm, RD)).astype(jnp.float32))

    fw = jnp.reshape(fusion_weights, (1, rank)).astype(jnp.float32)
    fb = jnp.reshape(fusion_bias, (1, D)).astype(jnp.float32)

    # ---- batch tiling: full-extent block for small B (handles B % 8 != 0),
    #      otherwise 128-row tiles (multiple of 8 sublanes) with padding. ----
    if batch_tile is None:
        batch_tile = B if B <= 128 else 128
    pad = (-B) % batch_tile
    if pad:
        flat = [jnp.pad(x, ((0, pad), (0, 0))) for x in flat]
    Bp = B + pad
    grid = (Bp // batch_tile,)

    out_dtype = flat[0].dtype

    in_specs = [pl.BlockSpec(memory_space=pltpu.MemorySpace.SMEM)]   # fusion_weights
    in_specs += [pl.BlockSpec((batch_tile, x.shape[1]), lambda i: (i, 0))
                 for x in flat]
    in_specs += [pl.BlockSpec(W.shape, lambda i: (0, 0)) for W in Ws]  # resident
    in_specs += [pl.BlockSpec((1, RD), lambda i: (0, 0)) for _ in bs]
    in_specs += [pl.BlockSpec((1, D), lambda i: (0, 0))]               # fusion_bias
    out_specs = pl.BlockSpec((batch_tile, D), lambda i: (i, 0))

    # ---- explicit VMEM budget (double-buffered blocks + headroom) ----
    def _bytes(shape, dtype):
        n = 1
        for s in shape:
            n *= int(s)
        return n * jnp.dtype(dtype).itemsize

    vmem = 0
    for x in flat:
        vmem += 2 * _bytes((batch_tile, x.shape[1]), x.dtype)
    for W in Ws:
        vmem += 2 * _bytes(W.shape, W.dtype)
    for b in bs:
        vmem += 2 * _bytes(b.shape, b.dtype)
    vmem += 2 * _bytes((1, D), fb.dtype)
    vmem += 2 * _bytes((batch_tile, D), out_dtype)
    # 2x headroom, clamped below v7x's 64 MiB physical VMEM.
    vmem_limit = int(min(48 * 1024 * 1024, max(4 * 1024 * 1024, 2 * vmem)))

    kernel = _make_lrtf_kernel(M, rank, D)

    out = pl.pallas_call(
        kernel,
        out_shape=jax.ShapeDtypeStruct((Bp, D), out_dtype),
        grid=grid,
        in_specs=in_specs,
        out_specs=out_specs,
        compiler_params=pltpu.CompilerParams(
            dimension_semantics=("parallel",),
            vmem_limit_bytes=vmem_limit,
        ),
        interpret=interpret,
    )(fw, *flat, *Ws, *bs, fb)

    return out[:B] if pad else out


if __name__ == "__main__":
    key = jax.random.PRNGKey(0)
    ks = jax.random.split(key, 8)

    # Small modalities consistent with typical multimodal fusion inputs.
    B = 2
    img = jax.random.normal(ks[0], (B, 4, 16, 16), dtype=jnp.float32)  # F = 1024
    seq = jax.random.normal(ks[1], (B, 8, 32), dtype=jnp.float32)      # F = 256
    vec = jax.random.normal(ks[2], (B, 40), dtype=jnp.float32)         # F = 40
    modalities = [img, seq, vec]

    input_dims = [1024, 256, 40]
    output_dim = 128      # lane-dense output width
    rank = 4

    factors = []
    for j, Fm in enumerate(input_dims):
        std = (2.0 / (Fm + 1 + output_dim)) ** 0.5   # xavier-normal-ish scale
        factors.append(std * jax.random.normal(
            ks[3 + j], (rank, Fm + 1, output_dim), dtype=jnp.float32))
    fusion_weights = jax.random.normal(ks[6], (1, rank), dtype=jnp.float32)
    fusion_bias = 0.1 * jax.random.normal(ks[7], (1, output_dim), dtype=jnp.float32)

    out = low_rank_tensor_fusion(modalities, factors, fusion_weights, fusion_bias)
    out = jax.block_until_ready(out)

    # Pure-JAX reference of the exact PyTorch forward semantics.
    def ref_forward(mods, facs, fwt, fbs):
        Bn = mods[0].shape[0]
        fused = None
        for m, f in zip(mods, facs):
            x = m.reshape(Bn, -1)
            ones = jnp.ones((Bn, 1), x.dtype)
            x1 = jnp.concatenate([ones, x], axis=1)
            mf = jnp.einsum("bf,rfd->rbd", x1, f,
                            precision=jax.lax.Precision.HIGHEST)
            fused = mf if fused is None else fused * mf
        o = jnp.einsum("r,rbd->bd", fwt[0], fused,
                       precision=jax.lax.Precision.HIGHEST) + fbs
        return o.reshape(-1, fbs.shape[-1])

    ref = ref_forward(modalities, factors, fusion_weights, fusion_bias)

    assert out.shape == (B, output_dim), out.shape
    assert out.dtype == ref.dtype, (out.dtype, ref.dtype)
    max_err = float(jnp.max(jnp.abs(out - ref)))
    assert jnp.allclose(out, ref, atol=2e-3, rtol=2e-3), max_err

    print("KERNEL_OK")
</pallas_src>

<mosaic_0001>
module attributes {stable_mosaic.version = 11 : i64} {
  func.func @kernel(%arg0: i32, %arg1: memref<1x4xf32, #tpu.memory_space<smem>>, %arg2: memref<2x1024xf32, #tpu.memory_space<vmem>>, %arg3: memref<2x256xf32, #tpu.memory_space<vmem>>, %arg4: memref<2x40xf32, #tpu.memory_space<vmem>>, %arg5: memref<1024x512xf32, #tpu.memory_space<vmem>>, %arg6: memref<256x512xf32, #tpu.memory_space<vmem>>, %arg7: memref<40x512xf32, #tpu.memory_space<vmem>>, %arg8: memref<1x512xf32, #tpu.memory_space<vmem>>, %arg9: memref<1x512xf32, #tpu.memory_space<vmem>>, %arg10: memref<1x512xf32, #tpu.memory_space<vmem>>, %arg11: memref<1x128xf32, #tpu.memory_space<vmem>>, %arg12: memref<2x128xf32, #tpu.memory_space<vmem>>) attributes {dimension_semantics = [#tpu.dimension_semantics<parallel>], iteration_bounds = array<i64: 1>, scalar_prefetch = 0 : i64, scratch_operands = 0 : i64, tpu.core_type = #tpu.core_type<tc>, window_params = [{transform_indices = @transform_0, window_bounds = array<i64: 1, 4>}, {transform_indices = @transform_1, window_bounds = array<i64: 2, 1024>}, {transform_indices = @transform_2, window_bounds = array<i64: 2, 256>}, {transform_indices = @transform_3, window_bounds = array<i64: 2, 40>}, {pipeline_mode = #tpu.pipeline_mode<synchronous>, transform_indices = @transform_4, window_bounds = array<i64: 1024, 512>}, {pipeline_mode = #tpu.pipeline_mode<synchronous>, transform_indices = @transform_5, window_bounds = array<i64: 256, 512>}, {pipeline_mode = #tpu.pipeline_mode<synchronous>, transform_indices = @transform_6, window_bounds = array<i64: 40, 512>}, {pipeline_mode = #tpu.pipeline_mode<synchronous>, transform_indices = @transform_7, window_bounds = array<i64: 1, 512>}, {pipeline_mode = #tpu.pipeline_mode<synchronous>, transform_indices = @transform_8, window_bounds = array<i64: 1, 512>}, {pipeline_mode = #tpu.pipeline_mode<synchronous>, transform_indices = @transform_9, window_bounds = array<i64: 1, 512>}, {pipeline_mode = #tpu.pipeline_mode<synchronous>, transform_indices = @transform_10, window_bounds = array<i64: 1, 128>}, {transform_indices = @transform_11, window_bounds = array<i64: 2, 128>}]} {
    %c0 = arith.constant 0 : index
    %c0_0 = arith.constant 0 : index
    %0 = vector.load %arg2[%c0, %c0_0] : memref<2x1024xf32, #tpu.memory_space<vmem>>, vector<2x1024xf32>
    %c0_1 = arith.constant 0 : index
    %c0_2 = arith.constant 0 : index
    %1 = vector.load %arg5[%c0_1, %c0_2] : memref<1024x512xf32, #tpu.memory_space<vmem>>, vector<1024x512xf32>
    %cst = arith.constant dense<0.000000e+00> : vector<2x512xf32>
    %2 = tpu.matmul %0, %1, %cst {dimension_numbers = #tpu.dot_dimension_numbers<[1], [0], [0], [1], [0, 0, 1, 1], [], []>} : vector<2x1024xf32>, vector<1024x512xf32>, vector<2x512xf32> -> vector<2x512xf32>
    %c0_3 = arith.constant 0 : index
    %c0_4 = arith.constant 0 : index
    %3 = vector.load %arg8[%c0_3, %c0_4] : memref<1x512xf32, #tpu.memory_space<vmem>>, vector<1x512xf32>
    %4 = vector.broadcast %3 : vector<1x512xf32> to vector<2x512xf32>
    %5 = arith.addf %2, %4 : vector<2x512xf32>
    %c0_5 = arith.constant 0 : index
    %c0_6 = arith.constant 0 : index
    %6 = vector.load %arg3[%c0_5, %c0_6] : memref<2x256xf32, #tpu.memory_space<vmem>>, vector<2x256xf32>
    %c0_7 = arith.constant 0 : index
    %c0_8 = arith.constant 0 : index
    %7 = vector.load %arg6[%c0_7, %c0_8] : memref<256x512xf32, #tpu.memory_space<vmem>>, vector<256x512xf32>
    %cst_9 = arith.constant dense<0.000000e+00> : vector<2x512xf32>
    %8 = tpu.matmul %6, %7, %cst_9 {dimension_numbers = #tpu.dot_dimension_numbers<[1], [0], [0], [1], [0, 0, 1, 1], [], []>} : vector<2x256xf32>, vector<256x512xf32>, vector<2x512xf32> -> vector<2x512xf32>
    %c0_10 = arith.constant 0 : index
    %c0_11 = arith.constant 0 : index
    %9 = vector.load %arg9[%c0_10, %c0_11] : memref<1x512xf32, #tpu.memory_space<vmem>>, vector<1x512xf32>
    %10 = vector.broadcast %9 : vector<1x512xf32> to vector<2x512xf32>
    %11 = arith.addf %8, %10 : vector<2x512xf32>
    %12 = arith.mulf %5, %11 : vector<2x512xf32>
    %c0_12 = arith.constant 0 : index
    %c0_13 = arith.constant 0 : index
    %13 = vector.load %arg4[%c0_12, %c0_13] : memref<2x40xf32, #tpu.memory_space<vmem>>, vector<2x40xf32>
    %c0_14 = arith.constant 0 : index
    %c0_15 = arith.constant 0 : index
    %14 = vector.load %arg7[%c0_14, %c0_15] : memref<40x512xf32, #tpu.memory_space<vmem>>, vector<40x512xf32>
    %cst_16 = arith.constant dense<0.000000e+00> : vector<2x512xf32>
    %15 = tpu.matmul %13, %14, %cst_16 {dimension_numbers = #tpu.dot_dimension_numbers<[1], [0], [0], [1], [0, 0, 1, 1], [], []>} : vector<2x40xf32>, vector<40x512xf32>, vector<2x512xf32> -> vector<2x512xf32>
    %c0_17 = arith.constant 0 : index
    %c0_18 = arith.constant 0 : index
    %16 = vector.load %arg10[%c0_17, %c0_18] : memref<1x512xf32, #tpu.memory_space<vmem>>, vector<1x512xf32>
    %17 = vector.broadcast %16 : vector<1x512xf32> to vector<2x512xf32>
    %18 = arith.addf %15, %17 : vector<2x512xf32>
    %19 = arith.mulf %12, %18 : vector<2x512xf32>
    %c0_19 = arith.constant 0 : index
    %c0_20 = arith.constant 0 : index
    %20 = memref.load %arg1[%c0_19, %c0_20] : memref<1x4xf32, #tpu.memory_space<smem>>
    %21 = vector.extract_strided_slice %19 {offsets = [0, 0], sizes = [2, 128], strides = [1, 1]} : vector<2x512xf32> to vector<2x128xf32>
    %22 = vector.broadcast %20 : f32 to vector<2x128xf32>
    %23 = arith.mulf %22, %21 : vector<2x128xf32>
    %c0_21 = arith.constant 0 : index
    %c1 = arith.constant 1 : index
    %24 = memref.load %arg1[%c0_21, %c1] : memref<1x4xf32, #tpu.memory_space<smem>>
    %25 = vector.extract_strided_slice %19 {offsets = [0, 128], sizes = [2, 128], strides = [1, 1]} : vector<2x512xf32> to vector<2x128xf32>
    %26 = vector.broadcast %24 : f32 to vector<2x128xf32>
    %27 = arith.mulf %26, %25 : vector<2x128xf32>
    %28 = arith.addf %23, %27 : vector<2x128xf32>
    %c0_22 = arith.constant 0 : index
    %c2 = arith.constant 2 : index
    %29 = memref.load %arg1[%c0_22, %c2] : memref<1x4xf32, #tpu.memory_space<smem>>
    %30 = vector.extract_strided_slice %19 {offsets = [0, 256], sizes = [2, 128], strides = [1, 1]} : vector<2x512xf32> to vector<2x128xf32>
    %31 = vector.broadcast %29 : f32 to vector<2x128xf32>
    %32 = arith.mulf %31, %30 : vector<2x128xf32>
    %33 = arith.addf %28, %32 : vector<2x128xf32>
    %c0_23 = arith.constant 0 : index
    %c3 = arith.constant 3 : index
    %34 = memref.load %arg1[%c0_23, %c3] : memref<1x4xf32, #tpu.memory_space<smem>>
    %35 = vector.extract_strided_slice %19 {offsets = [0, 384], sizes = [2, 128], strides = [1, 1]} : vector<2x512xf32> to vector<2x128xf32>
    %36 = vector.broadcast %34 : f32 to vector<2x128xf32>
    %37 = arith.mulf %36, %35 : vector<2x128xf32>
    %38 = arith.addf %33, %37 : vector<2x128xf32>
    %c0_24 = arith.constant 0 : index
    %c0_25 = arith.constant 0 : index
    %39 = vector.load %arg11[%c0_24, %c0_25] : memref<1x128xf32, #tpu.memory_space<vmem>>, vector<1x128xf32>
    %40 = vector.broadcast %39 : vector<1x128xf32> to vector<2x128xf32>
    %41 = arith.addf %38, %40 : vector<2x128xf32>
    %c0_26 = arith.constant 0 : index
    %c0_27 = arith.constant 0 : index
    %42 = vector.load %arg12[%c0_26, %c0_27] : memref<2x128xf32, #tpu.memory_space<vmem>>, vector<2x128xf32>
    tpu.vector_store %arg12[%c0_26, %c0_27], %41 {strides = array<i32>} : memref<2x128xf32, #tpu.memory_space<vmem>>, vector<2x128xf32>,
    return
  }
  func.func @transform_0(%arg0: i32) -> (i32, i32) {
    %c0_i32 = arith.constant 0 : i32
    %c0_i32_0 = arith.constant 0 : i32
    %c0_i32_1 = arith.constant 0 : i32
    return %c0_i32, %c0_i32_0 : i32, i32
  }
  func.func @transform_1(%arg0: i32) -> (i32, i32) {
    %c0_i32 = arith.constant 0 : i32
    %c0_i32_0 = arith.constant 0 : i32
    return %arg0, %c0_i32 : i32, i32
  }
  func.func @transform_2(%arg0: i32) -> (i32, i32) {
    %c0_i32 = arith.constant 0 : i32
    %c0_i32_0 = arith.constant 0 : i32
    return %arg0, %c0_i32 : i32, i32
  }
  func.func @transform_3(%arg0: i32) -> (i32, i32) {
    %c0_i32 = arith.constant 0 : i32
    %c0_i32_0 = arith.constant 0 : i32
    return %arg0, %c0_i32 : i32, i32
  }
  func.func @transform_4(%arg0: i32) -> (i32, i32) {
    %c0_i32 = arith.constant 0 : i32
    %c0_i32_0 = arith.constant 0 : i32
    %c0_i32_1 = arith.constant 0 : i32
    return %c0_i32, %c0_i32_0 : i32, i32
  }
  func.func @transform_5(%arg0: i32) -> (i32, i32) {
    %c0_i32 = arith.constant 0 : i32
    %c0_i32_0 = arith.constant 0 : i32
    %c0_i32_1 = arith.constant 0 : i32
    return %c0_i32, %c0_i32_0 : i32, i32
  }
  func.func @transform_6(%arg0: i32) -> (i32, i32) {
    %c0_i32 = arith.constant 0 : i32
    %c0_i32_0 = arith.constant 0 : i32
    %c0_i32_1 = arith.constant 0 : i32
    return %c0_i32, %c0_i32_0 : i32, i32
  }
  func.func @transform_7(%arg0: i32) -> (i32, i32) {
    %c0_i32 = arith.constant 0 : i32
    %c0_i32_0 = arith.constant 0 : i32
    %c0_i32_1 = arith.constant 0 : i32
    return %c0_i32, %c0_i32_0 : i32, i32
  }
  func.func @transform_8(%arg0: i32) -> (i32, i32) {
    %c0_i32 = arith.constant 0 : i32
    %c0_i32_0 = arith.constant 0 : i32
    %c0_i32_1 = arith.constant 0 : i32
    return %c0_i32, %c0_i32_0 : i32, i32
  }
  func.func @transform_9(%arg0: i32) -> (i32, i32) {
    %c0_i32 = arith.constant 0 : i32
    %c0_i32_0 = arith.constant 0 : i32
    %c0_i32_1 = arith.constant 0 : i32
    return %c0_i32, %c0_i32_0 : i32, i32
  }
  func.func @transform_10(%arg0: i32) -> (i32, i32) {
    %c0_i32 = arith.constant 0 : i32
    %c0_i32_0 = arith.constant 0 : i32
    %c0_i32_1 = arith.constant 0 : i32
    return %c0_i32, %c0_i32_0 : i32, i32
  }
  func.func @transform_11(%arg0: i32) -> (i32, i32) {
    %c0_i32 = arith.constant 0 : i32
    %c0_i32_0 = arith.constant 0 : i32
    return %arg0, %c0_i32 : i32, i32
  }
}

</mosaic_0001>

<bundles_post_ra>
// kernel: tpu_custom_call.1
= control target key start
LH: loop header
LB: loop body
LE: loop exit
PB: predicated region body
PF: predicated region fallthrough
CT: control target
= control target key end

     0   :  { %16 = vsyncpa [#allocation5], 0  ;;  %s3120_s0 = inlined_call_operand.hbm [shape: f32[1,4], index: 0, kind: input, shape index: {}]   ;;  %s3121_s1 = inlined_call_operand.hbm [shape: f32[2,1024], index: 1, kind: input, shape index: {}]   ;;  %s3122_s2 = inlined_call_operand.hbm [shape: f32[2,256], index: 2, kind: input, shape index: {}]   ;;  %s3123_s3 = inlined_call_operand.hbm [shape: f32[2,40], index: 3, kind: input, shape index: {}]   ;;  %s3124_s4 = inlined_call_operand.hbm [shape: f32[1024,512], index: 4, kind: input, shape index: {}]   ;;  %s3125_s5 = inlined_call_operand.hbm [shape: f32[256,512], index: 5, kind: input, shape index: {}]   ;;  %s3126_s6 = inlined_call_operand.hbm [shape: f32[40,512], index: 6, kind: input, shape index: {}]   ;;  %s3127_s7 = inlined_call_operand.hbm [shape: f32[1,512], index: 7, kind: input, shape index: {}]   ;;  %s3128_s8 = inlined_call_operand.hbm [shape: f32[1,512], index: 8, kind: input, shape index: {}]   ;;  %s3129_s9 = inlined_call_operand.hbm [shape: f32[1,512], index: 9, kind: input, shape index: {}]   ;;  %s3130_s10 = inlined_call_operand.hbm [shape: f32[1,128], index: 10, kind: input, shape index: {}]   ;;  %s3131_s11 = inlined_call_operand.hbm [shape: f32[2,128], index: 11, kind: output, shape index: {}]  }
   0x1   :  { %17 = vsyncpa [#allocation3], 0 }
   0x2   :  { %18 = vsyncpa [#allocation8], 0 }
   0x3   :  { %19 = vsyncpa [#allocation11], 0 }
   0x4   :  { %20 = vsyncpa [#allocation14], 0 }
   0x5   :  { %21 = vsyncpa [#allocation17], 0 }
   0x6   :  { %22 = vsyncpa [#allocation20], 0 }
   0x7   :  { %23 = vsyncpa [#allocation4], 0  ;;  %s2831_s17 = smov [#allocation7]   ;;  %s2832_s19 = smov [#allocation10]  }
   0x8   :  { %s48_s18 = sshll.u32 %s2831_s17, 4  ;;  %s67_s20 = sshll.u32 %s2832_s19, 4  ;;  %s49_s18 = int_to_ptr.vmem [resolvable:$true] %s48_s18  ;;  %s2907_s20 = int_to_ptr.vmem [resolvable:$true] %s67_s20 }
   0x9   :  { %s2563_s23 = scalar_lea.hbm %s3122_s2, 64 }
   0xa   :  { %p2564_p0 = scmp.ne.s32.totalorder %s3122_s2, %s2563_s23  ;;  %p2567_p1 = scmp.lt.u32.totalorder %s2563_s23, %s3122_s2 }
   0xc   :  { %p2569_p2 = pnand %p2567_p1, %p2564_p0 }
   0xe   :  { %2572 = shalt.err (!%p2569_p2)
}
   0xf   :  { %s2573_s28 = scalar_lea.vmem %s49_s18, 64  ;;  %p2578_p4 = scmp.lt.s32.totalorder %s49_s18, %s49_s18 }
  0x10   :  { %p2574_p3 = scmp.ne.s32.totalorder %s49_s18, %s2573_s28  ;;  %p2579_p5 = scmp.lt.s32.totalorder %s2573_s28, %s2573_s28 }
  0x12   :  { %p2580_p6 = por %p2579_p5, %p2578_p4 }
  0x14   :  { %p2581_p7 = pnand %p2580_p6, %p2574_p3 }
  0x16   :  { %2584 = shalt.err (!%p2581_p7)
}
  0x17   :  { %51 = dma.hbm_to_vmem [thread:$0]  %s3122_s2, 64, %s49_s18, [#allocation8]  }
  0x18   :  { %s2585_s14 = scalar_lea.hbm %s3124_s4, 65536 }
  0x19   :  { %p2586_p8 = scmp.ne.s32.totalorder %s3124_s4, %s2585_s14  ;;  %p2589_p9 = scmp.lt.u32.totalorder %s2585_s14, %s3124_s4 }
  0x1b   :  { %p2591_p10 = pnand %p2589_p9, %p2586_p8 }
  0x1d   :  { %2594 = shalt.err (!%p2591_p10)
}
  0x1e   :  { %s2595_s21 = scalar_lea.vmem %s2907_s20, 65536  ;;  %p2600_p12 = scmp.lt.s32.totalorder %s2907_s20, %s2907_s20 }
  0x1f   :  { %p2596_p11 = scmp.ne.s32.totalorder %s2907_s20, %s2595_s21  ;;  %p2601_p13 = scmp.lt.s32.totalorder %s2595_s21, %s2595_s21 }
  0x21   :  { %p2602_p0 = por %p2601_p13, %p2600_p12 }
  0x23   :  { %p2603_p1 = pnand %p2602_p0, %p2596_p11 }
  0x25   :  { %2606 = shalt.err (!%p2603_p1)
}
  0x26   :  { %s2833_s2 = smov 512   ;;  %s2834_s18 = smov 32  }
  0x27   :  { %73 = dma.hbm_to_vmem [thread:$0]  %s3124_s4, 65536, %s2907_s20, [#allocation11], %s2833_s2, %s2833_s2, %s2834_s18  }
  0x28   :  { %s2835_s24 = smov [#allocation13]   ;;  %s2836_s26 = smov [#allocation16]  }
  0x29   :  { %s91_s25 = sshll.u32 %s2835_s24, 4  ;;  %s114_s27 = sshll.u32 %s2836_s26, 4  ;;  %s92_s25 = int_to_ptr.vmem [resolvable:$true] %s91_s25  ;;  %s115_s27 = int_to_ptr.vmem [resolvable:$true] %s114_s27 }
  0x2a   :  { %s2607_s30 = scalar_lea.hbm %s3126_s6, 2560 }
  0x2b   :  { %p2608_p2 = scmp.ne.s32.totalorder %s3126_s6, %s2607_s30  ;;  %p2611_p3 = scmp.lt.u32.totalorder %s2607_s30, %s3126_s6 }
  0x2d   :  { %p2613_p4 = pnand %p2611_p3, %p2608_p2 }
  0x2f   :  { %2616 = shalt.err (!%p2613_p4)
}
  0x30   :  { %s2617_s4 = scalar_lea.vmem %s92_s25, 2560  ;;  %p2622_p6 = scmp.lt.s32.totalorder %s92_s25, %s92_s25 }
  0x31   :  { %p2618_p5 = scmp.ne.s32.totalorder %s92_s25, %s2617_s4  ;;  %p2623_p7 = scmp.lt.s32.totalorder %s2617_s4, %s2617_s4 }
  0x33   :  { %p2624_p8 = por %p2623_p7, %p2622_p6 }
  0x35   :  { %p2625_p9 = pnand %p2624_p8, %p2618_p5 }
  0x37   :  { %2628 = shalt.err (!%p2625_p9)
}
  0x38   :  { %97 = dma.hbm_to_vmem [thread:$0]  %s3126_s6, 2560, %s92_s25, [#allocation14], %s2833_s2, %s2833_s2, %s2834_s18  }
  0x39   :  { %s2629_s21 = scalar_lea.hbm %s3128_s8, 64 }
  0x3a   :  { %p2630_p10 = scmp.ne.s32.totalorder %s3128_s8, %s2629_s21  ;;  %p2633_p11 = scmp.lt.u32.totalorder %s2629_s21, %s3128_s8 }
  0x3c   :  { %p2635_p12 = pnand %p2633_p11, %p2630_p10 }
  0x3e   :  { %2638 = shalt.err (!%p2635_p12)
}
  0x3f   :  { %s2639_s28 = scalar_lea.vmem %s115_s27, 64  ;;  %p2644_p0 = scmp.lt.s32.totalorder %s115_s27, %s115_s27 }
  0x40   :  { %p2640_p13 = scmp.ne.s32.totalorder %s115_s27, %s2639_s28  ;;  %p2645_p1 = scmp.lt.s32.totalorder %s2639_s28, %s2639_s28 }
  0x42   :  { %p2646_p2 = por %p2645_p1, %p2644_p0 }
  0x44   :  { %p2647_p3 = pnand %p2646_p2, %p2640_p13 }
  0x46   :  { %2650 = shalt.err (!%p2647_p3)
}
  0x47   :  { %117 = dma.hbm_to_vmem [thread:$0]  %s3128_s8, 64, %s115_s27, [#allocation17]  }
  0x48   :  { %s2651_s12 = scalar_lea.hbm %s3120_s0, 16 }
  0x49   :  { %p2652_p4 = scmp.ne.s32.totalorder %s3120_s0, %s2651_s12  ;;  %p2655_p5 = scmp.lt.u32.totalorder %s2651_s12, %s3120_s0 }
  0x4b   :  { %p2657_p6 = pnand %p2655_p5, %p2652_p4 }
  0x4d   :  { %2660 = shalt.err (!%p2657_p6)
}
  0x4e   :  { %s2837_s20 = smov [#allocation2]   ;;  %s2838_s8 = smov [#allocation6]  }
  0x4f   :  { %31 = dma.hbm_to_smem %s3120_s0, 16, %s2837_s20, [#allocation5]  }
  0x50   :  { %s38_s27 = sshll.u32 %s2838_s8, 4  ;;  %s2839_s19 = smov [#allocation9]   ;;  %s39_s27 = int_to_ptr.vmem [resolvable:$true] %s38_s27 }
  0x51   :  { %s58_s21 = sshll.u32 %s2839_s19, 4  ;;  %s2661_s24 = scalar_lea.hbm %s3121_s1, 256  ;;  %s59_s21 = int_to_ptr.vmem [resolvable:$true] %s58_s21 }
  0x52   :  { %p2662_p7 = scmp.ne.s32.totalorder %s3121_s1, %s2661_s24  ;;  %p2665_p8 = scmp.lt.u32.totalorder %s2661_s24, %s3121_s1 }
  0x54   :  { %p2667_p9 = pnand %p2665_p8, %p2662_p7 }
  0x56   :  { %2670 = shalt.err (!%p2667_p9)
}
  0x57   :  { %s2671_s0 = scalar_lea.vmem %s39_s27, 256  ;;  %p2676_p11 = scmp.lt.s32.totalorder %s39_s27, %s39_s27 }
  0x58   :  { %p2672_p10 = scmp.ne.s32.totalorder %s39_s27, %s2671_s0  ;;  %p2677_p12 = scmp.lt.s32.totalorder %s2671_s0, %s2671_s0 }
  0x5a   :  { %p2678_p13 = por %p2677_p12, %p2676_p11 }
  0x5c   :  { %p2679_p0 = pnand %p2678_p13, %p2672_p10 }
  0x5e   :  { %2682 = shalt.err (!%p2679_p0)
}
  0x5f   :  { %41 = dma.hbm_to_vmem [thread:$0]  %s3121_s1, 256, %s39_s27, [#allocation3]  }
  0x60   :  { %s2683_s14 = scalar_lea.hbm %s3123_s3, 32 }
  0x61   :  { %p2684_p1 = scmp.ne.s32.totalorder %s3123_s3, %s2683_s14  ;;  %p2687_p2 = scmp.lt.u32.totalorder %s2683_s14, %s3123_s3 }
  0x63   :  { %p2689_p3 = pnand %p2687_p2, %p2684_p1 }
  0x65   :  { %2692 = shalt.err (!%p2689_p3)
}
  0x66   :  { %s2693_s17 = scalar_lea.vmem %s59_s21, 32  ;;  %p2698_p5 = scmp.lt.s32.totalorder %s59_s21, %s59_s21 }
  0x67   :  { %p2694_p4 = scmp.ne.s32.totalorder %s59_s21, %s2693_s17  ;;  %p2699_p6 = scmp.lt.s32.totalorder %s2693_s17, %s2693_s17 }
  0x69   :  { %p2700_p7 = por %p2699_p6, %p2698_p5 }
  0x6b   :  { %p2701_p8 = pnand %p2700_p7, %p2694_p4 }
  0x6d   :  { %2704 = shalt.err (!%p2701_p8)
}
  0x6e   :  { %61 = dma.hbm_to_vmem [thread:$0]  %s3123_s3, 32, %s59_s21, [#allocation8]  }
  0x6f   :  { %s2840_s27 = smov [#allocation12]   ;;  %s2841_s22 = smov [#allocation15]  }
  0x70   :  { %s79_s19 = sshll.u32 %s2840_s27, 4  ;;  %s104_s23 = sshll.u32 %s2841_s22, 4  ;;  %s80_s19 = int_to_ptr.vmem [resolvable:$true] %s79_s19  ;;  %s105_s23 = int_to_ptr.vmem [resolvable:$true] %s104_s23 }
  0x71   :  { %s2705_s28 = scalar_lea.hbm %s3125_s5, 16384 }
  0x72   :  { %p2706_p9 = scmp.ne.s32.totalorder %s3125_s5, %s2705_s28  ;;  %p2709_p10 = scmp.lt.u32.totalorder %s2705_s28, %s3125_s5 }
  0x74   :  { %p2711_p11 = pnand %p2709_p10, %p2706_p9 }
  0x76   :  { %2714 = shalt.err (!%p2711_p11)
}
  0x77   :  { %s2715_s3 = scalar_lea.vmem %s80_s19, 16384  ;;  %p2720_p13 = scmp.lt.s32.totalorder %s80_s19, %s80_s19 }
  0x78   :  { %p2716_p12 = scmp.ne.s32.totalorder %s80_s19, %s2715_s3  ;;  %p2721_p0 = scmp.lt.s32.totalorder %s2715_s3, %s2715_s3 }
  0x7a   :  { %p2722_p1 = por %p2721_p0, %p2720_p13 }
  0x7c   :  { %p2723_p2 = pnand %p2722_p1, %p2716_p12 }
  0x7e   :  { %2726 = shalt.err (!%p2723_p2)
}
  0x7f   :  { %85 = dma.hbm_to_vmem [thread:$0]  %s3125_s5, 16384, %s80_s19, [#allocation11], %s2833_s2, %s2833_s2, %s2834_s18  }
  0x80   :  { %s2727_s14 = scalar_lea.hbm %s3127_s7, 64 }
  0x81   :  { %p2728_p3 = scmp.ne.s32.totalorder %s3127_s7, %s2727_s14  ;;  %p2731_p4 = scmp.lt.u32.totalorder %s2727_s14, %s3127_s7 }
  0x83   :  { %p2733_p5 = pnand %p2731_p4, %p2728_p3 }
  0x85   :  { %2736 = shalt.err (!%p2733_p5)
}
  0x86   :  { %s2737_s17 = scalar_lea.vmem %s105_s23, 64  ;;  %p2742_p7 = scmp.lt.s32.totalorder %s105_s23, %s105_s23 }
  0x87   :  { %p2738_p6 = scmp.ne.s32.totalorder %s105_s23, %s2737_s17  ;;  %p2743_p8 = scmp.lt.s32.totalorder %s2737_s17, %s2737_s17 }
  0x89   :  { %p2744_p9 = por %p2743_p8, %p2742_p7 }
  0x8b   :  { %p2745_p10 = pnand %p2744_p9, %p2738_p6 }
  0x8d   :  { %2748 = shalt.err (!%p2745_p10)
}
  0x8e   :  { %107 = dma.hbm_to_vmem [thread:$0]  %s3127_s7, 64, %s105_s23, [#allocation14]  }
  0x8f   :  { %s2842_s18 = smov [#allocation18]   ;;  %s2843_s8 = smov [#allocation19]  }
  0x90   :  { %s124_s1 = sshll.u32 %s2842_s18, 4  ;;  %s134_s27 = sshll.u32 %s2843_s8, 4  ;;  %s125_s1 = int_to_ptr.vmem [resolvable:$true] %s124_s1  ;;  %s135_s27 = int_to_ptr.vmem [resolvable:$true] %s134_s27 }
  0x91   :  { %s2749_s24 = scalar_lea.hbm %s3129_s9, 64 }
  0x92   :  { %p2750_p11 = scmp.ne.s32.totalorder %s3129_s9, %s2749_s24  ;;  %p2753_p12 = scmp.lt.u32.totalorder %s2749_s24, %s3129_s9 }
  0x94   :  { %p2755_p13 = pnand %p2753_p12, %p2750_p11 }
  0x96   :  { %2758 = shalt.err (!%p2755_p13)
}
  0x97   :  { %s2759_s7 = scalar_lea.vmem %s125_s1, 64  ;;  %p2764_p1 = scmp.lt.s32.totalorder %s125_s1, %s125_s1 }
  0x98   :  { %p2760_p0 = scmp.ne.s32.totalorder %s125_s1, %s2759_s7  ;;  %p2765_p2 = scmp.lt.s32.totalorder %s2759_s7, %s2759_s7 }
  0x9a   :  { %p2766_p3 = por %p2765_p2, %p2764_p1 }
  0x9c   :  { %p2767_p4 = pnand %p2766_p3, %p2760_p0 }
  0x9e   :  { %2770 = shalt.err (!%p2767_p4)
}
  0x9f   :  { %127 = dma.hbm_to_vmem [thread:$0]  %s3129_s9, 64, %s125_s1, [#allocation17]  }
  0xa0   :  { %s2771_s21 = scalar_lea.hbm %s3130_s10, 16 }
  0xa1   :  { %p2772_p5 = scmp.ne.s32.totalorder %s3130_s10, %s2771_s21  ;;  %p2775_p6 = scmp.lt.u32.totalorder %s2771_s21, %s3130_s10 }
  0xa3   :  { %p2777_p7 = pnand %p2775_p6, %p2772_p5 }
  0xa5   :  { %2780 = shalt.err (!%p2777_p7)
}
  0xa6   :  { %s2781_s15 = scalar_lea.vmem %s135_s27, 16  ;;  %s2785_s4 = scalar_lea.vmem %s135_s27, 32 }
  0xa7   :  { %p2782_p8 = scmp.ne.s32.totalorder %s135_s27, %s2781_s15  ;;  %p2786_p9 = scmp.lt.s32.totalorder %s135_s27, %s135_s27 }
  0xa8   :  { %p2787_p10 = scmp.lt.s32.totalorder %s2785_s4, %s2781_s15 }
  0xaa   :  { %p2788_p11 = por %p2787_p10, %p2786_p9 }
  0xac   :  { %p2789_p12 = pnand %p2788_p11, %p2782_p8 }
  0xae   :  { %2792 = shalt.err (!%p2789_p12)
}
  0xaf   :  { %137 = dma.hbm_to_vmem [thread:$0]  %s3130_s10, 16, %s135_s27, [#allocation20]  }
  0xb0   :  { %2815 = dma.done.wait [#allocation5], 16  }
  0xb1   :  { %2816 = vsyncadd [#allocation5], 4294967280 }
  0xb2   :  { %2817 = dma.done.wait [#allocation3], 256  }
  0xb3   :  { %2818 = vsyncadd [#allocation3], 4294967040 }
  0xb4   :  { %2819 = dma.done.wait [#allocation8], 96  }
  0xb5   :  { %2820 = vsyncadd [#allocation8], 4294967200 }
  0xb6   :  { %2821 = dma.done.wait [#allocation11], 81920  }
  0xb7   :  { %2822 = vsyncadd [#allocation11], 4294885376 }
  0xb8   :  { %2823 = dma.done.wait [#allocation14], 2624  }
  0xb9   :  { %2824 = vsyncadd [#allocation14], 4294964672 }
  0xba   :  { %2825 = dma.done.wait [#allocation17], 128  }
  0xbb   :  { %2826 = vsyncadd [#allocation17], 4294967168 }
  0xbc   :  { %2827 = dma.done.wait [#allocation20], 16  }
  0xbd   :  { %2828 = vsyncadd [#allocation20], 4294967280 }
  0xbe   :  { %171 = sfence }
  0xbf   :  { %v175_v0 = vld [vmem:[#allocation10 + $0x8] sm:$0xff]  ;;  %v177_v2 = vld [vmem:[#allocation10 + $0x18] sm:$0xff]  ;;  %v174_v5 = vld [vmem:[#allocation10] sm:$0xff]  ;;  %vm1671_vm0 = vcmask 326656   ;;  %s1821_s10 = sld [smem:[#allocation2]]  ;;  %s1869_s16 = sld [smem:[#allocation2 + $0x1]] }
  0xc0   :  { %v179_v1 = vld [vmem:[#allocation10 + $0x28] sm:$0xff]  ;;  %v181_v4 = vld [vmem:[#allocation10 + $0x38] sm:$0xff]  ;;  %v178_v6 = vld [vmem:[#allocation10 + $0x20] sm:$0xff]  ;;  %s1870_s17 = sld [smem:[#allocation2 + $0x2]]  ;;  %s1871_s5 = sld [smem:[#allocation2 + $0x3]] }
  0xc1   :  { %v1873_v3 = vpack.c.bf16 %v179_v1, %v175_v0  ;;  %v2129_v7 = vpack.c.bf16 %v181_v4, %v177_v2  ;;  %v1875_v8 = vpack.c.bf16 %v178_v6, %v174_v5  ;;  %v176_v9 = vld [vmem:[#allocation10 + $0x10] sm:$0xff]  ;;  %v183_v11 = vld [vmem:[#allocation10 + $0x48] sm:$0xff]  ;;  %v185_v14 = vld [vmem:[#allocation10 + $0x58] sm:$0xff]  ;;  %s2846_s2 = smov [#allocation21]  }
  0xc2   :  { %v180_v10 = vld [vmem:[#allocation10 + $0x30] sm:$0xff]  ;;  %v187_v13 = vld [vmem:[#allocation10 + $0x68] sm:$0xff]  ;;  %v189_v15 = vld [vmem:[#allocation10 + $0x78] sm:$0xff]  ;;  %s1851_s18 = sshll.u32 %s2846_s2, 4  ;;  %s1852_s18 = int_to_ptr.vmem [resolvable:$true] %s1851_s18 }
  0xc3   :  { %1874 = vmatprep.subr.bf16.mxu0 %v1873_v3  ;;  %v2131_v12 = vpack.c.bf16 %v180_v10, %v176_v9  ;;  %2130 = vmatprep.subr.bf16.mxu1 %v2129_v7  ;;  %v1877_v16 = vpack.c.bf16 %v187_v13, %v183_v11  ;;  %v2133_v17 = vpack.c.bf16 %v189_v15, %v185_v14  ;;  %v182_v18 = vld [vmem:[#allocation10 + $0x40] sm:$0xff]  ;;  %v184_v20 = vld [vmem:[#allocation10 + $0x50] sm:$0xff]  ;;  %v191_v23 = vld [vmem:[#allocation10 + $0x88] sm:$0xff]  ;;  %s2793_s1 = scalar_lea.vmem %s1852_s18, 32  ;;  %p2798_p0 = scmp.lt.s32.totalorder %s1852_s18, %s1852_s18 }
  0xc4   :  { %1876 = vmatpush1.bf16.msra.mxu0 %v1875_v8  ;;  %v186_v19 = vld [vmem:[#allocation10 + $0x60] sm:$0xff]  ;;  %v188_v22 = vld [vmem:[#allocation10 + $0x70] sm:$0xff]  ;;  %v195_v24 = vld [vmem:[#allocation10 + $0xa8] sm:$0xff]  ;;  %p2794_p13 = scmp.ne.s32.totalorder %s1852_s18, %s2793_s1  ;;  %p2799_p1 = scmp.lt.s32.totalorder %s2793_s1, %s2793_s1 }
  0xc5   :  { %2132 = vmatpush1.bf16.msra.mxu1 %v2131_v12  ;;  %v1879_v21 = vpack.c.bf16 %v186_v19, %v182_v18  ;;  %1878 = vmatprep.subr.bf16.mxu0 %v1877_v16  ;;  %v2135_v25 = vpack.c.bf16 %v188_v22, %v184_v20  ;;  %v1881_v26 = vpack.c.bf16 %v195_v24, %v191_v23  ;;  %v193_v27 = vld [vmem:[#allocation10 + $0x98] sm:$0xff]  ;;  %v190_v29 = vld [vmem:[#allocation10 + $0x80] sm:$0xff]  ;;  %v192_v32 = vld [vmem:[#allocation10 + $0x90] sm:$0xff] }
  0xc6   :  { %2134 = vmatprep.subr.bf16.mxu1 %v2133_v17  ;;  %v197_v28 = vld [vmem:[#allocation10 + $0xb8] sm:$0xff]  ;;  %v194_v31 = vld [vmem:[#allocation10 + $0xa0] sm:$0xff]  ;;  %v196_v33 = vld [vmem:[#allocation10 + $0xb0] sm:$0xff]  ;;  %p2800_p2 = por %p2799_p1, %p2798_p0 }
  0xc7   :  { %v2137_v30 = vpack.c.bf16 %v197_v28, %v193_v27  ;;  %v1883_v34 = vpack.c.bf16 %v194_v31, %v190_v29  ;;  %v199_v35 = vld [vmem:[#allocation10 + $0xc8] sm:$0xff]  ;;  %v201_v37 = vld [vmem:[#allocation10 + $0xd8] sm:$0xff]  ;;  %v2139_v38 = vpack.c.bf16 %v196_v33, %v192_v32  ;;  %v198_v41 = vld [vmem:[#allocation10 + $0xc0] sm:$0xff] }
  0xc8   :  { %1880 = vmatpush1.bf16.msra.mxu0 %v1879_v21  ;;  %v203_v36 = vld [vmem:[#allocation10 + $0xe8] sm:$0xff]  ;;  %v205_v40 = vld [vmem:[#allocation10 + $0xf8] sm:$0xff]  ;;  %v202_v42 = vld [vmem:[#allocation10 + $0xe0] sm:$0xff]  ;;  %p2801_p3 = pnand %p2800_p2, %p2794_p13 }
  0xc9   :  { %2136 = vmatpush1.bf16.msra.mxu1 %v2135_v25  ;;  %1882 = vmatprep.subr.bf16.mxu0 %v1881_v26  ;;  %v1885_v39 = vpack.c.bf16 %v203_v36, %v199_v35  ;;  %v2141_v43 = vpack.c.bf16 %v205_v40, %v201_v37  ;;  %v200_v44 = vld [vmem:[#allocation10 + $0xd0] sm:$0xff]  ;;  %v207_v46 = vld [vmem:[#allocation10 + $0x108] sm:$0xff]  ;;  %v209_v48 = vld [vmem:[#allocation10 + $0x118] sm:$0xff]  ;;  %v1887_v50 = vpack.c.bf16 %v202_v42, %v198_v41 }
  0xca   :  { %2138 = vmatprep.subr.bf16.mxu1 %v2137_v30  ;;  %v204_v45 = vld [vmem:[#allocation10 + $0xf0] sm:$0xff]  ;;  %v211_v47 = vld [vmem:[#allocation10 + $0x128] sm:$0xff]  ;;  %v213_v49 = vld [vmem:[#allocation10 + $0x138] sm:$0xff] }
  0xcb   :  { %v2143_v51 = vpack.c.bf16 %v204_v45, %v200_v44  ;;  %v1889_v52 = vpack.c.bf16 %v211_v47, %v207_v46  ;;  %v206_v53 = vld [vmem:[#allocation10 + $0x100] sm:$0xff]  ;;  %v208_v55 = vld [vmem:[#allocation10 + $0x110] sm:$0xff]  ;;  %v2145_v56 = vpack.c.bf16 %v213_v49, %v209_v48  ;;  %v215_v58 = vld [vmem:[#allocation10 + $0x148] sm:$0xff]  ;;  %v688_v46 = vlaneseq }
  0xcc   :  { %1884 = vmatpush1.bf16.msra.mxu0 %v1883_v34  ;;  %v210_v54 = vld [vmem:[#allocation10 + $0x120] sm:$0xff]  ;;  %v212_v57 = vld [vmem:[#allocation10 + $0x130] sm:$0xff]  ;;  %v219_v59 = vld [vmem:[#allocation10 + $0x168] sm:$0xff]  ;;  %v2844_v47 = vmov 1983009808  }
  0xcd   :  { %2140 = vmatpush1.bf16.msra.mxu1 %v2139_v38  ;;  %1886 = vmatprep.subr.bf16.mxu0 %v1885_v39  ;;  %v217_v60 = vld [vmem:[#allocation10 + $0x158] sm:$0xff]  ;;  %v1891_v62 = vpack.c.bf16 %v210_v54, %v206_v53  ;;  %v2147_v63 = vpack.c.bf16 %v212_v57, %v208_v55  ;;  %v1893_v0 = vpack.c.bf16 %v219_v59, %v215_v58  ;;  %v214_v1 = vld [vmem:[#allocation10 + $0x140] sm:$0xff]  ;;  %v216_v3 = vld [vmem:[#allocation10 + $0x150] sm:$0xff]  ;;  %v712_v48 = vunpack.c.l.s4 %v2844_v47 }
  0xce   :  { %2142 = vmatprep.subr.bf16.mxu1 %v2141_v43  ;;  %v221_v61 = vld [vmem:[#allocation10 + $0x178] sm:$0xff]  ;;  %v218_v2 = vld [vmem:[#allocation10 + $0x160] sm:$0xff]  ;;  %v220_v5 = vld [vmem:[#allocation10 + $0x170] sm:$0xff] }
  0xcf   :  { %v2149_v4 = vpack.c.bf16 %v221_v61, %v217_v60  ;;  %v223_v6 = vld [vmem:[#allocation10 + $0x188] sm:$0xff]  ;;  %v225_v8 = vld [vmem:[#allocation10 + $0x198] sm:$0xff]  ;;  %v1895_v10 = vpack.c.bf16 %v218_v2, %v214_v1  ;;  %v2151_v11 = vpack.c.bf16 %v220_v5, %v216_v3  ;;  %v222_v13 = vld [vmem:[#allocation10 + $0x180] sm:$0xff]  ;;  %v3055_v61 = vshrl.u32 %v688_v46, 7 }
  0xd0   :  { %1888 = vmatpush1.bf16.msra.mxu0 %v1887_v50  ;;  %v227_v7 = vld [vmem:[#allocation10 + $0x1a8] sm:$0xff]  ;;  %v229_v9 = vld [vmem:[#allocation10 + $0x1b8] sm:$0xff]  ;;  %v226_v14 = vld [vmem:[#allocation10 + $0x1a0] sm:$0xff] }
  0xd1   :  { %2144 = vmatpush1.bf16.msra.mxu1 %v2143_v51  ;;  %1890 = vmatprep.subr.bf16.mxu0 %v1889_v52  ;;  %v1897_v12 = vpack.c.bf16 %v227_v7, %v223_v6  ;;  %v224_v15 = vld [vmem:[#allocation10 + $0x190] sm:$0xff]  ;;  %v2153_v16 = vpack.c.bf16 %v229_v9, %v225_v8  ;;  %v231_v18 = vld [vmem:[#allocation10 + $0x1c8] sm:$0xff]  ;;  %v233_v20 = vld [vmem:[#allocation10 + $0x1d8] sm:$0xff]  ;;  %v1899_v22 = vpack.c.bf16 %v226_v14, %v222_v13 }
  0xd2   :  { %2146 = vmatprep.subr.bf16.mxu1 %v2145_v56  ;;  %v228_v17 = vld [vmem:[#allocation10 + $0x1b0] sm:$0xff]  ;;  %v235_v19 = vld [vmem:[#allocation10 + $0x1e8] sm:$0xff]  ;;  %v237_v21 = vld [vmem:[#allocation10 + $0x1f8] sm:$0xff] }
  0xd3   :  { %v2155_v23 = vpack.c.bf16 %v228_v17, %v224_v15  ;;  %v1901_v24 = vpack.c.bf16 %v235_v19, %v231_v18  ;;  %v230_v25 = vld [vmem:[#allocation10 + $0x1c0] sm:$0xff]  ;;  %v232_v27 = vld [vmem:[#allocation10 + $0x1d0] sm:$0xff]  ;;  %v2157_v28 = vpack.c.bf16 %v237_v21, %v233_v20  ;;  %v239_v30 = vld [vmem:[#allocation10 + $0x208] sm:$0xff] }
  0xd4   :  { %1892 = vmatpush1.bf16.msra.mxu0 %v1891_v62  ;;  %v234_v26 = vld [vmem:[#allocation10 + $0x1e0] sm:$0xff]  ;;  %v236_v29 = vld [vmem:[#allocation10 + $0x1f0] sm:$0xff]  ;;  %v243_v31 = vld [vmem:[#allocation10 + $0x228] sm:$0xff]  ;;  %v713_v62 = vunpack.c.0.s8 %v712_v48 }
  0xd5   :  { %2148 = vmatpush1.bf16.msra.mxu1 %v2147_v63  ;;  %1894 = vmatprep.subr.bf16.mxu0 %v1893_v0  ;;  %v241_v32 = vld [vmem:[#allocation10 + $0x218] sm:$0xff]  ;;  %v1903_v34 = vpack.c.bf16 %v234_v26, %v230_v25  ;;  %v2159_v35 = vpack.c.bf16 %v236_v29, %v232_v27  ;;  %v1905_v36 = vpack.c.bf16 %v243_v31, %v239_v30  ;;  %v238_v37 = vld [vmem:[#allocation10 + $0x200] sm:$0xff]  ;;  %v240_v39 = vld [vmem:[#allocation10 + $0x210] sm:$0xff] }
  0xd6   :  { %2150 = vmatprep.subr.bf16.mxu1 %v2149_v4  ;;  %v245_v33 = vld [vmem:[#allocation10 + $0x238] sm:$0xff]  ;;  %v242_v38 = vld [vmem:[#allocation10 + $0x220] sm:$0xff]  ;;  %v244_v41 = vld [vmem:[#allocation10 + $0x230] sm:$0xff] }
  0xd7   :  { %v2161_v40 = vpack.c.bf16 %v245_v33, %v241_v32  ;;  %v247_v42 = vld [vmem:[#allocation10 + $0x248] sm:$0xff]  ;;  %v249_v44 = vld [vmem:[#allocation10 + $0x258] sm:$0xff]  ;;  %v1907_v49 = vpack.c.bf16 %v242_v38, %v238_v37  ;;  %v2163_v50 = vpack.c.bf16 %v244_v41, %v240_v39  ;;  %v246_v52 = vld [vmem:[#allocation10 + $0x240] sm:$0xff] }
  0xd8   :  { %1896 = vmatpush1.bf16.msra.mxu0 %v1895_v10  ;;  %v251_v43 = vld [vmem:[#allocation10 + $0x268] sm:$0xff]  ;;  %v253_v45 = vld [vmem:[#allocation10 + $0x278] sm:$0xff]  ;;  %v250_v53 = vld [vmem:[#allocation10 + $0x260] sm:$0xff] }
  0xd9   :  { %2152 = vmatpush1.bf16.msra.mxu1 %v2151_v11  ;;  %1898 = vmatprep.subr.bf16.mxu0 %v1897_v12  ;;  %v1909_v51 = vpack.c.bf16 %v251_v43, %v247_v42  ;;  %v248_v54 = vld [vmem:[#allocation10 + $0x250] sm:$0xff]  ;;  %v2165_v55 = vpack.c.bf16 %v253_v45, %v249_v44  ;;  %v255_v57 = vld [vmem:[#allocation10 + $0x288] sm:$0xff]  ;;  %v257_v59 = vld [vmem:[#allocation10 + $0x298] sm:$0xff]  ;;  %v1911_v63 = vpack.c.bf16 %v250_v53, %v246_v52 }
  0xda   :  { %2154 = vmatprep.subr.bf16.mxu1 %v2153_v16  ;;  %v252_v56 = vld [vmem:[#allocation10 + $0x270] sm:$0xff]  ;;  %v259_v58 = vld [vmem:[#allocation10 + $0x2a8] sm:$0xff]  ;;  %v261_v60 = vld [vmem:[#allocation10 + $0x2b8] sm:$0xff]  ;;  %v3058_v11 = vsub.s32 %v713_v62, %v3055_v61 }
  0xdb   :  { %v2167_v0 = vpack.c.bf16 %v252_v56, %v248_v54  ;;  %v1913_v1 = vpack.c.bf16 %v259_v58, %v255_v57  ;;  %v254_v2 = vld [vmem:[#allocation10 + $0x280] sm:$0xff]  ;;  %v256_v4 = vld [vmem:[#allocation10 + $0x290] sm:$0xff]  ;;  %v2169_v5 = vpack.c.bf16 %v261_v60, %v257_v59  ;;  %v263_v7 = vld [vmem:[#allocation10 + $0x2c8] sm:$0xff] }
  0xdc   :  { %1900 = vmatpush1.bf16.msra.mxu0 %v1899_v22  ;;  %v258_v3 = vld [vmem:[#allocation10 + $0x2a0] sm:$0xff]  ;;  %v260_v6 = vld [vmem:[#allocation10 + $0x2b0] sm:$0xff]  ;;  %v267_v8 = vld [vmem:[#allocation10 + $0x2e8] sm:$0xff] }
  0xdd   :  { %2156 = vmatpush1.bf16.msra.mxu1 %v2155_v23  ;;  %1902 = vmatprep.subr.bf16.mxu0 %v1901_v24  ;;  %v265_v9 = vld [vmem:[#allocation10 + $0x2d8] sm:$0xff]  ;;  %v1915_v12 = vpack.c.bf16 %v258_v3, %v254_v2  ;;  %v262_v13 = vld [vmem:[#allocation10 + $0x2c0] sm:$0xff]  ;;  %v2171_v14 = vpack.c.bf16 %v260_v6, %v256_v4  ;;  %v1917_v15 = vpack.c.bf16 %v267_v8, %v263_v7  ;;  %v264_v17 = vld [vmem:[#allocation10 + $0x2d0] sm:$0xff] }
  0xde   :  { %2158 = vmatprep.subr.bf16.mxu1 %v2157_v28  ;;  %v269_v10 = vld [vmem:[#allocation10 + $0x2f8] sm:$0xff]  ;;  %v266_v16 = vld [vmem:[#allocation10 + $0x2e0] sm:$0xff]  ;;  %v268_v18 = vld [vmem:[#allocation10 + $0x2f0] sm:$0xff] }
  0xdf   :  { %v2173_v19 = vpack.c.bf16 %v269_v10, %v265_v9  ;;  %v271_v20 = vld [vmem:[#allocation10 + $0x308] sm:$0xff]  ;;  %v273_v23 = vld [vmem:[#allocation10 + $0x318] sm:$0xff]  ;;  %v1919_v26 = vpack.c.bf16 %v266_v16, %v262_v13  ;;  %v2175_v27 = vpack.c.bf16 %v268_v18, %v264_v17  ;;  %v270_v29 = vld [vmem:[#allocation10 + $0x300] sm:$0xff] }
  0xe0   :  { %1904 = vmatpush1.bf16.msra.mxu0 %v1903_v34  ;;  %v275_v21 = vld [vmem:[#allocation10 + $0x328] sm:$0xff]  ;;  %v277_v24 = vld [vmem:[#allocation10 + $0x338] sm:$0xff]  ;;  %v274_v30 = vld [vmem:[#allocation10 + $0x320] sm:$0xff] }
  0xe1   :  { %2160 = vmatpush1.bf16.msra.mxu1 %v2159_v35  ;;  %1906 = vmatprep.subr.bf16.mxu0 %v1905_v36  ;;  %v3060_v22 = vld [vmem:[#allocation6] sm:$0xff]  ;;  %v1921_v28 = vpack.c.bf16 %v275_v21, %v271_v20  ;;  %v2177_v33 = vpack.c.bf16 %v277_v24, %v273_v23  ;;  %v281_v37 = vld [vmem:[#allocation10 + $0x358] sm:$0xff]  ;;  %v1923_v39 = vpack.c.bf16 %v274_v30, %v270_v29  ;;  %v278_v42 = vld [vmem:[#allocation10 + $0x340] sm:$0xff] }
  0xe2   :  { %2162 = vmatprep.subr.bf16.mxu1 %v2161_v40  ;;  %v3064_v25 = vrot.slane %v3060_v22, %v3058_v11  ;;  %v272_v31 = vld [vmem:[#allocation10 + $0x310] sm:$0xff]  ;;  %v279_v35 = vld [vmem:[#allocation10 + $0x348] sm:$0xff]  ;;  %v285_v38 = vld [vmem:[#allocation10 + $0x378] sm:$0xff]  ;;  %v710_v8 = vcombine.high %v3060_v22, %v3060_v22 }
  0xe3   :  { %v276_v34 = vld [vmem:[#allocation10 + $0x330] sm:$0xff]  ;;  %v283_v36 = vld [vmem:[#allocation10 + $0x368] sm:$0xff]  ;;  %v282_v43 = vld [vmem:[#allocation10 + $0x360] sm:$0xff]  ;;  %v2181_v45 = vpack.c.bf16 %v285_v38, %v281_v37 }
  0xe4   :  { %1908 = vmatpush1.bf16.msra.mxu0 %v1907_v49  ;;  %v725_v32 = vcombine.high %v3064_v25, %v3064_v25  ;;  %v2179_v40 = vpack.c.bf16 %v276_v34, %v272_v31  ;;  %v1925_v41 = vpack.c.bf16 %v283_v36, %v279_v35  ;;  %v280_v44 = vld [vmem:[#allocation10 + $0x350] sm:$0xff]  ;;  %v287_v47 = vld [vmem:[#allocation10 + $0x388] sm:$0xff]  ;;  %v289_v49 = vld [vmem:[#allocation10 + $0x398] sm:$0xff]  ;;  %v3071_v22 = vrot.slane %v710_v8, %v3058_v11 }
  0xe5   :  { %2164 = vmatpush1.bf16.msra.mxu1 %v2163_v50  ;;  %1910 = vmatprep.subr.bf16.mxu0 %v1909_v51  ;;  %v284_v46 = vld [vmem:[#allocation10 + $0x370] sm:$0xff]  ;;  %v291_v48 = vld [vmem:[#allocation10 + $0x3a8] sm:$0xff]  ;;  %v293_v50 = vld [vmem:[#allocation10 + $0x3b8] sm:$0xff]  ;;  %v1927_v51 = vpack.c.bf16 %v282_v43, %v278_v42 }
  0xe6   :  { %2166 = vmatprep.subr.bf16.mxu1 %v2165_v55  ;;  %816 = vmatprep.mubr.f32.mxu0 %v725_v32  ;;  %v2183_v52 = vpack.c.bf16 %v284_v46, %v280_v44  ;;  %v1929_v53 = vpack.c.bf16 %v291_v48, %v287_v47  ;;  %v286_v54 = vld [vmem:[#allocation10 + $0x380] sm:$0xff]  ;;  %v288_v56 = vld [vmem:[#allocation10 + $0x390] sm:$0xff]  ;;  %v2185_v57 = vpack.c.bf16 %v293_v50, %v289_v49  ;;  %v295_v59 = vld [vmem:[#allocation10 + $0x3c8] sm:$0xff] }
  0xe7   :  { %1100 = vmatprep.mubr.f32.mxu1 %v725_v32  ;;  %v290_v55 = vld [vmem:[#allocation10 + $0x3a0] sm:$0xff]  ;;  %v292_v58 = vld [vmem:[#allocation10 + $0x3b0] sm:$0xff]  ;;  %v299_v60 = vld [vmem:[#allocation10 + $0x3e8] sm:$0xff]  ;;  %v726_v38 = vcombine.high %v3071_v22, %v3071_v22 }
  0xe8   :  { %1912 = vmatpush1.bf16.msra.mxu0 %v1911_v63  ;;  %v297_v62 = vld [vmem:[#allocation10 + $0x3d8] sm:$0xff]  ;;  %v1933_v2 = vpack.c.bf16 %v299_v60, %v295_v59  ;;  %v294_v3 = vld [vmem:[#allocation10 + $0x3c0] sm:$0xff]  ;;  %v300_v7 = vld [vmem:[#allocation10 + $0x3f0] sm:$0xff] }
  0xe9   :  { %2168 = vmatpush1.bf16.msra.mxu1 %v2167_v0  ;;  %1914 = vmatprep.subr.bf16.mxu0 %v1913_v1  ;;  %v301_v63 = vld [vmem:[#allocation10 + $0x3f8] sm:$0xff]  ;;  %v1931_v0 = vpack.c.bf16 %v290_v55, %v286_v54  ;;  %v2187_v1 = vpack.c.bf16 %v292_v58, %v288_v56  ;;  %v298_v4 = vld [vmem:[#allocation10 + $0x3e0] sm:$0xff]  ;;  %v303_v9 = vld [vmem:[#allocation10 + $0x408] sm:$0xff] }
  0xea   :  { %2170 = vmatprep.subr.bf16.mxu1 %v2169_v5  ;;  %v296_v5 = vld [vmem:[#allocation10 + $0x3d0] sm:$0xff]  ;;  %v2189_v6 = vpack.c.bf16 %v301_v63, %v297_v62  ;;  %v307_v10 = vld [vmem:[#allocation10 + $0x428] sm:$0xff]  ;;  %v309_v13 = vld [vmem:[#allocation10 + $0x438] sm:$0xff] }
  0xeb   :  { %v1937_v16 = vpack.c.bf16 %v307_v10, %v303_v9  ;;  %v302_v17 = vld [vmem:[#allocation10 + $0x400] sm:$0xff]  ;;  %v308_v21 = vld [vmem:[#allocation10 + $0x430] sm:$0xff]  ;;  %v311_v23 = vld [vmem:[#allocation10 + $0x448] sm:$0xff] }
  0xec   :  { %1916 = vmatpush1.bf16.msra.mxu0 %v1915_v12  ;;  %v305_v12 = vld [vmem:[#allocation10 + $0x418] sm:$0xff]  ;;  %v306_v18 = vld [vmem:[#allocation10 + $0x420] sm:$0xff]  ;;  %v315_v24 = vld [vmem:[#allocation10 + $0x468] sm:$0xff] }
  0xed   :  { %2172 = vmatpush1.bf16.msra.mxu1 %v2171_v14  ;;  %1918 = vmatprep.subr.bf16.mxu0 %v1917_v15  ;;  %v1935_v14 = vpack.c.bf16 %v298_v4, %v294_v3  ;;  %v2191_v15 = vpack.c.bf16 %v300_v7, %v296_v5  ;;  %v2193_v20 = vpack.c.bf16 %v309_v13, %v305_v12  ;;  %v310_v31 = vld [vmem:[#allocation10 + $0x440] sm:$0xff]  ;;  %v316_v35 = vld [vmem:[#allocation10 + $0x470] sm:$0xff]  ;;  %v319_v36 = vld [vmem:[#allocation10 + $0x488] sm:$0xff] }
  0xee   :  { %2174 = vmatprep.subr.bf16.mxu1 %v2173_v19  ;;  %v304_v19 = vld [vmem:[#allocation10 + $0x410] sm:$0xff]  ;;  %v1941_v30 = vpack.c.bf16 %v315_v24, %v311_v23  ;;  %v314_v32 = vld [vmem:[#allocation10 + $0x460] sm:$0xff]  ;;  %v323_v37 = vld [vmem:[#allocation10 + $0x4a8] sm:$0xff] }
  0xef   :  { %v2195_v29 = vpack.c.bf16 %v308_v21, %v304_v19  ;;  %v1945_v43 = vpack.c.bf16 %v323_v37, %v319_v36  ;;  %v318_v44 = vld [vmem:[#allocation10 + $0x480] sm:$0xff]  ;;  %v320_v46 = vld [vmem:[#allocation10 + $0x490] sm:$0xff]  ;;  %v327_v49 = vld [vmem:[#allocation10 + $0x4c8] sm:$0xff] }
  0xf0   :  { %1920 = vmatpush1.bf16.msra.mxu0 %v1919_v26  ;;  %v313_v26 = vld [vmem:[#allocation10 + $0x458] sm:$0xff]  ;;  %v324_v48 = vld [vmem:[#allocation10 + $0x4b0] sm:$0xff]  ;;  %v331_v50 = vld [vmem:[#allocation10 + $0x4e8] sm:$0xff] }
  0xf1   :  { %2176 = vmatpush1.bf16.msra.mxu1 %v2175_v27  ;;  %1922 = vmatprep.subr.bf16.mxu0 %v1921_v28  ;;  %v317_v27 = vld [vmem:[#allocation10 + $0x478] sm:$0xff]  ;;  %v1939_v28 = vpack.c.bf16 %v306_v18, %v302_v17  ;;  %v1949_v54 = vpack.c.bf16 %v331_v50, %v327_v49  ;;  %v326_v55 = vld [vmem:[#allocation10 + $0x4c0] sm:$0xff]  ;;  %v332_v59 = vld [vmem:[#allocation10 + $0x4f0] sm:$0xff] }
  0xf2   :  { %2178 = vmatprep.subr.bf16.mxu1 %v2177_v33  ;;  %v312_v33 = vld [vmem:[#allocation10 + $0x450] sm:$0xff]  ;;  %v2197_v34 = vpack.c.bf16 %v317_v27, %v313_v26  ;;  %v330_v56 = vld [vmem:[#allocation10 + $0x4e0] sm:$0xff]  ;;  %v335_v60 = vld [vmem:[#allocation10 + $0x508] sm:$0xff] }
  0xf3   :  { %v2199_v42 = vpack.c.bf16 %v316_v35, %v312_v33  ;;  %v339_v62 = vld [vmem:[#allocation10 + $0x528] sm:$0xff]  ;;  %v337_v63 = vld [vmem:[#allocation10 + $0x518] sm:$0xff]  ;;  %v334_v4 = vld [vmem:[#allocation10 + $0x500] sm:$0xff] }
  0xf4   :  { %1924 = vmatpush1.bf16.msra.mxu0 %v1923_v39  ;;  %v321_v39 = vld [vmem:[#allocation10 + $0x498] sm:$0xff]  ;;  %v1953_v3 = vpack.c.bf16 %v339_v62, %v335_v60  ;;  %v338_v5 = vld [vmem:[#allocation10 + $0x520] sm:$0xff]  ;;  %v340_v8 = vld [vmem:[#allocation10 + $0x530] sm:$0xff] }
  0xf5   :  { %2180 = vmatpush1.bf16.msra.mxu1 %v2179_v40  ;;  %1926 = vmatprep.subr.bf16.mxu0 %v1925_v41  ;;  %v325_v40 = vld [vmem:[#allocation10 + $0x4b8] sm:$0xff]  ;;  %v1943_v41 = vpack.c.bf16 %v314_v32, %v310_v31  ;;  %v343_v9 = vld [vmem:[#allocation10 + $0x548] sm:$0xff]  ;;  %v342_v17 = vld [vmem:[#allocation10 + $0x540] sm:$0xff] }
  0xf6   :  { %2182 = vmatprep.subr.bf16.mxu1 %v2181_v45  ;;  %v322_v45 = vld [vmem:[#allocation10 + $0x4a0] sm:$0xff]  ;;  %v2201_v47 = vpack.c.bf16 %v325_v40, %v321_v39  ;;  %v347_v10 = vld [vmem:[#allocation10 + $0x568] sm:$0xff]  ;;  %v345_v12 = vld [vmem:[#allocation10 + $0x558] sm:$0xff] }
  0xf7   :  { %v349_v13 = vld [vmem:[#allocation10 + $0x578] sm:$0xff]  ;;  %v346_v18 = vld [vmem:[#allocation10 + $0x560] sm:$0xff]  ;;  %v344_v19 = vld [vmem:[#allocation10 + $0x550] sm:$0xff] }
  0xf8   :  { %1928 = vmatpush1.bf16.msra.mxu0 %v1927_v51  ;;  %v329_v51 = vld [vmem:[#allocation10 + $0x4d8] sm:$0xff]  ;;  %v348_v21 = vld [vmem:[#allocation10 + $0x570] sm:$0xff]  ;;  %v351_v23 = vld [vmem:[#allocation10 + $0x588] sm:$0xff] }
  0xf9   :  { %2184 = vmatpush1.bf16.msra.mxu1 %v2183_v52  ;;  %1930 = vmatprep.subr.bf16.mxu0 %v1929_v53  ;;  %v333_v52 = vld [vmem:[#allocation10 + $0x4f8] sm:$0xff]  ;;  %v1947_v53 = vpack.c.bf16 %v322_v45, %v318_v44  ;;  %v355_v24 = vld [vmem:[#allocation10 + $0x5a8] sm:$0xff]  ;;  %v350_v31 = vld [vmem:[#allocation10 + $0x580] sm:$0xff] }
  0xfa   :  { %2186 = vmatprep.subr.bf16.mxu1 %v2185_v57  ;;  %v328_v57 = vld [vmem:[#allocation10 + $0x4d0] sm:$0xff]  ;;  %v2205_v58 = vpack.c.bf16 %v333_v52, %v329_v51  ;;  %v353_v26 = vld [vmem:[#allocation10 + $0x598] sm:$0xff]  ;;  %v354_v32 = vld [vmem:[#allocation10 + $0x5a0] sm:$0xff] }
  0xfb   :  { %v357_v27 = vld [vmem:[#allocation10 + $0x5b8] sm:$0xff]  ;;  %v352_v33 = vld [vmem:[#allocation10 + $0x590] sm:$0xff]  ;;  %v359_v36 = vld [vmem:[#allocation10 + $0x5c8] sm:$0xff]  ;;  %v1963_v40 = vpack.c.bf16 %v354_v32, %v350_v31 }
  0xfc   :  { %1932 = vmatpush1.bf16.msra.mxu0 %v1931_v0  ;;  %v341_v0 = vld [vmem:[#allocation10 + $0x538] sm:$0xff]  ;;  %v356_v35 = vld [vmem:[#allocation10 + $0x5b0] sm:$0xff]  ;;  %v363_v37 = vld [vmem:[#allocation10 + $0x5e8] sm:$0xff] }
  0xfd   :  { %2188 = vmatpush1.bf16.msra.mxu1 %v2187_v1  ;;  %1934 = vmatprep.subr.bf16.mxu0 %v1933_v2  ;;  %v1951_v1 = vpack.c.bf16 %v330_v56, %v326_v55  ;;  %v2207_v2 = vpack.c.bf16 %v332_v59, %v328_v57  ;;  %v2209_v7 = vpack.c.bf16 %v341_v0, %v337_v63  ;;  %v365_v39 = vld [vmem:[#allocation10 + $0x5f8] sm:$0xff]  ;;  %v362_v44 = vld [vmem:[#allocation10 + $0x5e0] sm:$0xff]  ;;  %v360_v45 = vld [vmem:[#allocation10 + $0x5d0] sm:$0xff] }
  0xfe   :  { %2190 = vmatprep.subr.bf16.mxu1 %v2189_v6  ;;  %v336_v6 = vld [vmem:[#allocation10 + $0x510] sm:$0xff]  ;;  %v371_v49 = vld [vmem:[#allocation10 + $0x628] sm:$0xff]  ;;  %v369_v50 = vld [vmem:[#allocation10 + $0x618] sm:$0xff] }
  0xff   :  { %v373_v51 = vld [vmem:[#allocation10 + $0x638] sm:$0xff]  ;;  %v370_v55 = vld [vmem:[#allocation10 + $0x620] sm:$0xff]  ;;  %v368_v56 = vld [vmem:[#allocation10 + $0x610] sm:$0xff] }
 0x100   :  { %1936 = vmatpush1.bf16.msra.mxu0 %v1935_v14  ;;  %v1955_v14 = vpack.c.bf16 %v338_v5, %v334_v4  ;;  %v2225_v57 = vpack.c.bf16 %v373_v51, %v369_v50  ;;  %v375_v59 = vld [vmem:[#allocation10 + $0x648] sm:$0xff]  ;;  %v377_v62 = vld [vmem:[#allocation10 + $0x658] sm:$0xff]  ;;  %v378_v4 = vld [vmem:[#allocation10 + $0x660] sm:$0xff] }
 0x101   :  { %2192 = vmatpush1.bf16.msra.mxu1 %v2191_v15  ;;  %1938 = vmatprep.subr.bf16.mxu0 %v1937_v16  ;;  %v2211_v15 = vpack.c.bf16 %v340_v8, %v336_v6  ;;  %v1957_v16 = vpack.c.bf16 %v347_v10, %v343_v9  ;;  %v379_v60 = vld [vmem:[#allocation10 + $0x668] sm:$0xff]  ;;  %v381_v63 = vld [vmem:[#allocation10 + $0x678] sm:$0xff]  ;;  %v376_v5 = vld [vmem:[#allocation10 + $0x650] sm:$0xff] }
 0x102   :  { %2194 = vmatprep.subr.bf16.mxu1 %v2193_v20  ;;  %v2213_v20 = vpack.c.bf16 %v349_v13, %v345_v12  ;;  %v2229_v6 = vpack.c.bf16 %v381_v63, %v377_v62  ;;  %v383_v8 = vld [vmem:[#allocation10 + $0x688] sm:$0xff]  ;;  %v385_v10 = vld [vmem:[#allocation10 + $0x698] sm:$0xff]  ;;  %v394_v31 = vld [vmem:[#allocation10 + $0x6e0] sm:$0xff] }
 0x103   :  { %817 = vmatmul.mubr.f32.vlgmr.msra.gmra.mrb[0].mxu0 %v3064_v25  ;;  %v387_v9 = vld [vmem:[#allocation10 + $0x6a8] sm:$0xff]  ;;  %v389_v12 = vld [vmem:[#allocation10 + $0x6b8] sm:$0xff]  ;;  %v392_v32 = vld [vmem:[#allocation10 + $0x6d0] sm:$0xff] }
 0x104   :  { %1940 = vmatpush1.bf16.msra.mxu0 %v1939_v28  ;;  %1101 = vmatmul.mubr.f32.vlgmr.msra.gmra.mrb[0].mxu1 %v3064_v25  ;;  %v2203_v25 = vpack.c.bf16 %v324_v48, %v320_v46  ;;  %v1959_v28 = vpack.c.bf16 %v346_v18, %v342_v17  ;;  %v367_v48 = vld [vmem:[#allocation10 + $0x608] sm:$0xff]  ;;  %v386_v17 = vld [vmem:[#allocation10 + $0x6a0] sm:$0xff]  ;;  %v384_v18 = vld [vmem:[#allocation10 + $0x690] sm:$0xff] }
 0x105   :  { %2196 = vmatpush1.bf16.msra.mxu1 %v2195_v29  ;;  %1942 = vmatprep.subr.bf16.mxu0 %v1941_v30  ;;  %v2215_v29 = vpack.c.bf16 %v348_v21, %v344_v19  ;;  %v1961_v30 = vpack.c.bf16 %v355_v24, %v351_v23  ;;  %v2233_v19 = vpack.c.bf16 %v389_v12, %v385_v10  ;;  %v391_v21 = vld [vmem:[#allocation10 + $0x6c8] sm:$0xff]  ;;  %v393_v24 = vld [vmem:[#allocation10 + $0x6d8] sm:$0xff] }
 0x106   :  { %2198 = vmatprep.subr.bf16.mxu1 %v2197_v34  ;;  %887 = vmatprep.mubr.f32.mxu0 %v726_v38  ;;  %v2217_v34 = vpack.c.bf16 %v357_v27, %v353_v26  ;;  %v395_v23 = vld [vmem:[#allocation10 + $0x6e8] sm:$0xff]  ;;  %v397_v26 = vld [vmem:[#allocation10 + $0x6f8] sm:$0xff] }
 0x107   :  { %1171 = vmatprep.mubr.f32.mxu1 %v726_v38  ;;  %v361_v38 = vld [vmem:[#allocation10 + $0x5d8] sm:$0xff] }
 0x108   :  { %1944 = vmatpush1.bf16.msra.mxu0 %v1943_v41  ;;  %v2219_v41 = vpack.c.bf16 %v356_v35, %v352_v33  ;;  %v2221_v46 = vpack.c.bf16 %v365_v39, %v361_v38  ;;  %v2237_v33 = vpack.c.bf16 %v397_v26, %v393_v24  ;;  %v399_v35 = vld [vmem:[#allocation10 + $0x708] sm:$0xff]  ;;  %v405_v38 = vld [vmem:[#allocation10 + $0x738] sm:$0xff] }
 0x109   :  { %2200 = vmatpush1.bf16.msra.mxu1 %v2199_v42  ;;  %1946 = vmatprep.subr.bf16.mxu0 %v1945_v43  ;;  %v1965_v42 = vpack.c.bf16 %v363_v37, %v359_v36  ;;  %v358_v43 = vld [vmem:[#allocation10 + $0x5c0] sm:$0xff]  ;;  %v403_v36 = vld [vmem:[#allocation10 + $0x728] sm:$0xff]  ;;  %v401_v37 = vld [vmem:[#allocation10 + $0x718] sm:$0xff] }
 0x10a   :  { %2202 = vmatprep.subr.bf16.mxu1 %v2201_v47  ;;  %v364_v47 = vld [vmem:[#allocation10 + $0x5f0] sm:$0xff]  ;;  %v1967_v52 = vpack.c.bf16 %v362_v44, %v358_v43  ;;  %v402_v43 = vld [vmem:[#allocation10 + $0x720] sm:$0xff]  ;;  %v413_v50 = vld [vmem:[#allocation10 + $0x778] sm:$0xff] }
 0x10b   :  { %v400_v44 = vld [vmem:[#allocation10 + $0x710] sm:$0xff]  ;;  %v421_v62 = vld [vmem:[#allocation10 + $0x7b8] sm:$0xff] }
 0x10c   :  { %1948 = vmatpush1.bf16.msra.mxu0 %v1947_v53  ;;  %v2223_v53 = vpack.c.bf16 %v364_v47, %v360_v45  ;;  %v2241_v45 = vpack.c.bf16 %v405_v38, %v401_v37  ;;  %v407_v47 = vld [vmem:[#allocation10 + $0x748] sm:$0xff]  ;;  %v429_v10 = vld [vmem:[#allocation10 + $0x7f8] sm:$0xff] }
 0x10d   :  { %2204 = vmatpush1.bf16.msra.mxu1 %v2203_v25  ;;  %1950 = vmatprep.subr.bf16.mxu0 %v1949_v54  ;;  %v1969_v25 = vpack.c.bf16 %v371_v49, %v367_v48  ;;  %v366_v54 = vld [vmem:[#allocation10 + $0x600] sm:$0xff]  ;;  %v411_v48 = vld [vmem:[#allocation10 + $0x768] sm:$0xff]  ;;  %v409_v49 = vld [vmem:[#allocation10 + $0x758] sm:$0xff] }
 0x10e   :  { %2206 = vmatprep.subr.bf16.mxu1 %v2205_v58  ;;  %v372_v58 = vld [vmem:[#allocation10 + $0x630] sm:$0xff]  ;;  %v1971_v0 = vpack.c.bf16 %v370_v55, %v366_v54  ;;  %v410_v54 = vld [vmem:[#allocation10 + $0x760] sm:$0xff]  ;;  %v437_v24 = vld [vmem:[#allocation10 + $0x838] sm:$0xff] }
 0x10f   :  { %v408_v55 = vld [vmem:[#allocation10 + $0x750] sm:$0xff]  ;;  %v445_v37 = vld [vmem:[#allocation10 + $0x878] sm:$0xff] }
 0x110   :  { %1952 = vmatpush1.bf16.msra.mxu0 %v1951_v1  ;;  %v2227_v1 = vpack.c.bf16 %v372_v58, %v368_v56  ;;  %v2245_v56 = vpack.c.bf16 %v413_v50, %v409_v49  ;;  %v415_v58 = vld [vmem:[#allocation10 + $0x788] sm:$0xff]  ;;  %v449_v50 = vld [vmem:[#allocation10 + $0x898] sm:$0xff] }
 0x111   :  { %2208 = vmatpush1.bf16.msra.mxu1 %v2207_v2  ;;  %1954 = vmatprep.subr.bf16.mxu0 %v1953_v3  ;;  %v1973_v2 = vpack.c.bf16 %v379_v60, %v375_v59  ;;  %v374_v3 = vld [vmem:[#allocation10 + $0x640] sm:$0xff]  ;;  %v419_v59 = vld [vmem:[#allocation10 + $0x7a8] sm:$0xff]  ;;  %v417_v60 = vld [vmem:[#allocation10 + $0x798] sm:$0xff] }
 0x112   :  { %2210 = vmatprep.subr.bf16.mxu1 %v2209_v7  ;;  %v380_v7 = vld [vmem:[#allocation10 + $0x670] sm:$0xff]  ;;  %v1975_v13 = vpack.c.bf16 %v378_v4, %v374_v3  ;;  %v418_v3 = vld [vmem:[#allocation10 + $0x7a0] sm:$0xff]  ;;  %v451_v49 = vld [vmem:[#allocation10 + $0x8a8] sm:$0xff] }
 0x113   :  { %v416_v4 = vld [vmem:[#allocation10 + $0x790] sm:$0xff] }
 0x114   :  { %1956 = vmatpush1.bf16.msra.mxu0 %v1955_v14  ;;  %v2231_v14 = vpack.c.bf16 %v380_v7, %v376_v5  ;;  %v2249_v5 = vpack.c.bf16 %v421_v62, %v417_v60  ;;  %v423_v7 = vld [vmem:[#allocation10 + $0x7c8] sm:$0xff] }
 0x115   :  { %2212 = vmatpush1.bf16.msra.mxu1 %v2211_v15  ;;  %1958 = vmatprep.subr.bf16.mxu0 %v1957_v16  ;;  %v1977_v15 = vpack.c.bf16 %v387_v9, %v383_v8  ;;  %v382_v16 = vld [vmem:[#allocation10 + $0x680] sm:$0xff]  ;;  %v427_v8 = vld [vmem:[#allocation10 + $0x7e8] sm:$0xff]  ;;  %v425_v9 = vld [vmem:[#allocation10 + $0x7d8] sm:$0xff] }
 0x116   :  { %2214 = vmatprep.subr.bf16.mxu1 %v2213_v20  ;;  %v388_v20 = vld [vmem:[#allocation10 + $0x6b0] sm:$0xff]  ;;  %v1979_v27 = vpack.c.bf16 %v386_v17, %v382_v16  ;;  %v426_v16 = vld [vmem:[#allocation10 + $0x7e0] sm:$0xff]  ;;  %v455_v60 = vld [vmem:[#allocation10 + $0x8c8] sm:$0xff] }
 0x117   :  { %v424_v17 = vld [vmem:[#allocation10 + $0x7d0] sm:$0xff]  ;;  %v459_v62 = vld [vmem:[#allocation10 + $0x8e8] sm:$0xff] }
 0x118   :  { %1960 = vmatpush1.bf16.msra.mxu0 %v1959_v28  ;;  %v2235_v28 = vpack.c.bf16 %v388_v20, %v384_v18  ;;  %v2253_v18 = vpack.c.bf16 %v429_v10, %v425_v9  ;;  %v431_v20 = vld [vmem:[#allocation10 + $0x808] sm:$0xff]  ;;  %v465_v10 = vld [vmem:[#allocation10 + $0x918] sm:$0xff] }
 0x119   :  { %2216 = vmatpush1.bf16.msra.mxu1 %v2215_v29  ;;  %1962 = vmatprep.subr.bf16.mxu0 %v1961_v30  ;;  %v1981_v29 = vpack.c.bf16 %v395_v23, %v391_v21  ;;  %v390_v30 = vld [vmem:[#allocation10 + $0x6c0] sm:$0xff]  ;;  %v435_v21 = vld [vmem:[#allocation10 + $0x828] sm:$0xff]  ;;  %v433_v23 = vld [vmem:[#allocation10 + $0x818] sm:$0xff] }
 0x11a   :  { %2218 = vmatprep.subr.bf16.mxu1 %v2217_v34  ;;  %v396_v34 = vld [vmem:[#allocation10 + $0x6f0] sm:$0xff]  ;;  %v1983_v39 = vpack.c.bf16 %v394_v31, %v390_v30  ;;  %v434_v30 = vld [vmem:[#allocation10 + $0x820] sm:$0xff]  ;;  %v467_v9 = vld [vmem:[#allocation10 + $0x928] sm:$0xff] }
 0x11b   :  { %v432_v31 = vld [vmem:[#allocation10 + $0x810] sm:$0xff] }
 0x11c   :  { %1964 = vmatpush1.bf16.msra.mxu0 %v1963_v40  ;;  %v2239_v40 = vpack.c.bf16 %v396_v34, %v392_v32  ;;  %v2257_v32 = vpack.c.bf16 %v437_v24, %v433_v23  ;;  %v439_v34 = vld [vmem:[#allocation10 + $0x848] sm:$0xff]  ;;  %v473_v24 = vld [vmem:[#allocation10 + $0x958] sm:$0xff] }
 0x11d   :  { %2220 = vmatpush1.bf16.msra.mxu1 %v2219_v41  ;;  %1966 = vmatprep.subr.bf16.mxu0 %v1965_v42  ;;  %v1985_v41 = vpack.c.bf16 %v403_v36, %v399_v35  ;;  %v398_v42 = vld [vmem:[#allocation10 + $0x700] sm:$0xff]  ;;  %v443_v35 = vld [vmem:[#allocation10 + $0x868] sm:$0xff]  ;;  %v441_v36 = vld [vmem:[#allocation10 + $0x858] sm:$0xff] }
 0x11e   :  { %2222 = vmatprep.subr.bf16.mxu1 %v2221_v46  ;;  %v404_v46 = vld [vmem:[#allocation10 + $0x730] sm:$0xff]  ;;  %v1987_v51 = vpack.c.bf16 %v402_v43, %v398_v42  ;;  %v438_v42 = vld [vmem:[#allocation10 + $0x840] sm:$0xff]  ;;  %v475_v23 = vld [vmem:[#allocation10 + $0x968] sm:$0xff] }
 0x11f   :  { %v442_v43 = vld [vmem:[#allocation10 + $0x860] sm:$0xff] }
 0x120   :  { %1968 = vmatpush1.bf16.msra.mxu0 %v1967_v52  ;;  %v2243_v52 = vpack.c.bf16 %v404_v46, %v400_v44  ;;  %v440_v44 = vld [vmem:[#allocation10 + $0x850] sm:$0xff]  ;;  %v2261_v46 = vpack.c.bf16 %v445_v37, %v441_v36  ;;  %v483_v36 = vld [vmem:[#allocation10 + $0x9a8] sm:$0xff]  ;;  %v481_v37 = vld [vmem:[#allocation10 + $0x998] sm:$0xff] }
 0x121   :  { %2224 = vmatpush1.bf16.msra.mxu1 %v2223_v53  ;;  %1970 = vmatprep.subr.bf16.mxu0 %v1969_v25  ;;  %v1989_v53 = vpack.c.bf16 %v411_v48, %v407_v47  ;;  %v406_v25 = vld [vmem:[#allocation10 + $0x740] sm:$0xff]  ;;  %v444_v47 = vld [vmem:[#allocation10 + $0x870] sm:$0xff]  ;;  %v447_v48 = vld [vmem:[#allocation10 + $0x888] sm:$0xff] }
 0x122   :  { %2226 = vmatprep.subr.bf16.mxu1 %v2225_v57  ;;  %v412_v57 = vld [vmem:[#allocation10 + $0x770] sm:$0xff]  ;;  %v1991_v63 = vpack.c.bf16 %v410_v54, %v406_v25  ;;  %v2263_v25 = vpack.c.bf16 %v444_v47, %v440_v44  ;;  %v2009_v54 = vpack.c.bf16 %v451_v49, %v447_v48  ;;  %v482_v44 = vld [vmem:[#allocation10 + $0x9a0] sm:$0xff]  ;;  %v487_v49 = vld [vmem:[#allocation10 + $0x9c8] sm:$0xff] }
 0x123   :  { %v484_v48 = vld [vmem:[#allocation10 + $0x9b0] sm:$0xff] }
 0x124   :  { %1972 = vmatpush1.bf16.msra.mxu0 %v1971_v0  ;;  %v2247_v0 = vpack.c.bf16 %v412_v57, %v408_v55  ;;  %v446_v55 = vld [vmem:[#allocation10 + $0x880] sm:$0xff]  ;;  %v448_v57 = vld [vmem:[#allocation10 + $0x890] sm:$0xff] }
 0x125   :  { %2228 = vmatpush1.bf16.msra.mxu1 %v2227_v1  ;;  %1974 = vmatprep.subr.bf16.mxu0 %v1973_v2  ;;  %v1993_v1 = vpack.c.bf16 %v419_v59, %v415_v58  ;;  %v414_v2 = vld [vmem:[#allocation10 + $0x780] sm:$0xff]  ;;  %v452_v59 = vld [vmem:[#allocation10 + $0x8b0] sm:$0xff] }
 0x126   :  { %2230 = vmatprep.subr.bf16.mxu1 %v2229_v6  ;;  %v420_v6 = vld [vmem:[#allocation10 + $0x7b0] sm:$0xff]  ;;  %v1995_v12 = vpack.c.bf16 %v418_v3, %v414_v2  ;;  %v2013_v2 = vpack.c.bf16 %v459_v62, %v455_v60  ;;  %v454_v3 = vld [vmem:[#allocation10 + $0x8c0] sm:$0xff]  ;;  %v495_v60 = vld [vmem:[#allocation10 + $0xa08] sm:$0xff] }
 0x127   :  { %v499_v62 = vld [vmem:[#allocation10 + $0xa28] sm:$0xff] }
 0x128   :  { %1976 = vmatpush1.bf16.msra.mxu0 %v1975_v13  ;;  %v2251_v13 = vpack.c.bf16 %v420_v6, %v416_v4  ;;  %v458_v4 = vld [vmem:[#allocation10 + $0x8e0] sm:$0xff] }
 0x129   :  { %2232 = vmatpush1.bf16.msra.mxu1 %v2231_v14  ;;  %1978 = vmatprep.subr.bf16.mxu0 %v1977_v15  ;;  %v1997_v14 = vpack.c.bf16 %v427_v8, %v423_v7  ;;  %v422_v15 = vld [vmem:[#allocation10 + $0x7c0] sm:$0xff]  ;;  %v460_v7 = vld [vmem:[#allocation10 + $0x8f0] sm:$0xff]  ;;  %v463_v8 = vld [vmem:[#allocation10 + $0x908] sm:$0xff] }
 0x12a   :  { %2234 = vmatprep.subr.bf16.mxu1 %v2233_v19  ;;  %v428_v19 = vld [vmem:[#allocation10 + $0x7f0] sm:$0xff]  ;;  %v1999_v26 = vpack.c.bf16 %v426_v16, %v422_v15  ;;  %v2017_v15 = vpack.c.bf16 %v467_v9, %v463_v8  ;;  %v462_v16 = vld [vmem:[#allocation10 + $0x900] sm:$0xff]  ;;  %v503_v8 = vld [vmem:[#allocation10 + $0xa48] sm:$0xff] }
 0x12b   :  { %v507_v9 = vld [vmem:[#allocation10 + $0xa68] sm:$0xff] }
 0x12c   :  { %1980 = vmatpush1.bf16.msra.mxu0 %v1979_v27  ;;  %v2255_v27 = vpack.c.bf16 %v428_v19, %v424_v17  ;;  %v466_v17 = vld [vmem:[#allocation10 + $0x920] sm:$0xff] }
 0x12d   :  { %2236 = vmatpush1.bf16.msra.mxu1 %v2235_v28  ;;  %1982 = vmatprep.subr.bf16.mxu0 %v1981_v29  ;;  %v2001_v28 = vpack.c.bf16 %v435_v21, %v431_v20  ;;  %v430_v29 = vld [vmem:[#allocation10 + $0x800] sm:$0xff]  ;;  %v468_v20 = vld [vmem:[#allocation10 + $0x930] sm:$0xff]  ;;  %v471_v21 = vld [vmem:[#allocation10 + $0x948] sm:$0xff] }
 0x12e   :  { %2238 = vmatprep.subr.bf16.mxu1 %v2237_v33  ;;  %v436_v33 = vld [vmem:[#allocation10 + $0x830] sm:$0xff]  ;;  %v2003_v38 = vpack.c.bf16 %v434_v30, %v430_v29  ;;  %v2021_v29 = vpack.c.bf16 %v475_v23, %v471_v21  ;;  %v470_v30 = vld [vmem:[#allocation10 + $0x940] sm:$0xff]  ;;  %v511_v21 = vld [vmem:[#allocation10 + $0xa88] sm:$0xff] }
 0x12f   :  { %v515_v23 = vld [vmem:[#allocation10 + $0xaa8] sm:$0xff] }
 0x130   :  { %1984 = vmatpush1.bf16.msra.mxu0 %v1983_v39  ;;  %v3077_v39 = vld [vmem:[#allocation6 + $0x8] sm:$0xff] }
 0x131   :  { %2240 = vmatpush1.bf16.msra.mxu1 %v2239_v40  ;;  %1986 = vmatprep.subr.bf16.mxu0 %v1985_v41  ;;  %v2259_v40 = vpack.c.bf16 %v436_v33, %v432_v31  ;;  %v2005_v41 = vpack.c.bf16 %v443_v35, %v439_v34  ;;  %v474_v31 = vld [vmem:[#allocation10 + $0x960] sm:$0xff]  ;;  %v476_v34 = vld [vmem:[#allocation10 + $0x970] sm:$0xff]  ;;  %v479_v35 = vld [vmem:[#allocation10 + $0x988] sm:$0xff] }
 0x132   :  { %2242 = vmatprep.subr.bf16.mxu1 %v2241_v45  ;;  %v3081_v45 = vrot.slane %v3077_v39, %v3058_v11 }
 0x134   :  { %1988 = vmatpush1.bf16.msra.mxu0 %v1987_v51  ;;  %v453_v51 = vld [vmem:[#allocation10 + $0x8b8] sm:$0xff] }
 0x135   :  { %2244 = vmatpush1.bf16.msra.mxu1 %v2243_v52  ;;  %1990 = vmatprep.subr.bf16.mxu0 %v1989_v53  ;;  %v742_v52 = vcombine.high %v3081_v45, %v3081_v45  ;;  %v2007_v53 = vpack.c.bf16 %v442_v43, %v438_v42  ;;  %v2265_v58 = vpack.c.bf16 %v453_v51, %v449_v50  ;;  %v478_v43 = vld [vmem:[#allocation10 + $0x980] sm:$0xff]  ;;  %v491_v50 = vld [vmem:[#allocation10 + $0x9e8] sm:$0xff]  ;;  %v489_v51 = vld [vmem:[#allocation10 + $0x9d8] sm:$0xff] }
 0x136   :  { %2246 = vmatprep.subr.bf16.mxu1 %v2245_v56  ;;  %v450_v56 = vld [vmem:[#allocation10 + $0x8a0] sm:$0xff]  ;;  %v2025_v42 = vpack.c.bf16 %v483_v36, %v479_v35  ;;  %v519_v35 = vld [vmem:[#allocation10 + $0xac8] sm:$0xff] }
 0x137   :  { %v523_v36 = vld [vmem:[#allocation10 + $0xae8] sm:$0xff] }
 0x138   :  { %1992 = vmatpush1.bf16.msra.mxu0 %v1991_v63  ;;  %v457_v63 = vld [vmem:[#allocation10 + $0x8d8] sm:$0xff] }
 0x139   :  { %2248 = vmatpush1.bf16.msra.mxu1 %v2247_v0  ;;  %1994 = vmatprep.subr.bf16.mxu0 %v1993_v1  ;;  %v461_v0 = vld [vmem:[#allocation10 + $0x8f8] sm:$0xff]  ;;  %v2011_v1 = vpack.c.bf16 %v450_v56, %v446_v55  ;;  %v486_v55 = vld [vmem:[#allocation10 + $0x9c0] sm:$0xff] }
 0x13a   :  { %2250 = vmatprep.subr.bf16.mxu1 %v2249_v5  ;;  %v456_v5 = vld [vmem:[#allocation10 + $0x8d0] sm:$0xff]  ;;  %v2269_v6 = vpack.c.bf16 %v461_v0, %v457_v63  ;;  %v490_v56 = vld [vmem:[#allocation10 + $0x9e0] sm:$0xff]  ;;  %v497_v63 = vld [vmem:[#allocation10 + $0xa18] sm:$0xff] }
 0x13b   :  { %v501_v0 = vld [vmem:[#allocation10 + $0xa38] sm:$0xff] }
 0x13c   :  { %1996 = vmatpush1.bf16.msra.mxu0 %v1995_v12  ;;  %v469_v12 = vld [vmem:[#allocation10 + $0x938] sm:$0xff] }
 0x13d   :  { %2252 = vmatpush1.bf16.msra.mxu1 %v2251_v13  ;;  %1998 = vmatprep.subr.bf16.mxu0 %v1997_v14  ;;  %v2015_v13 = vpack.c.bf16 %v458_v4, %v454_v3  ;;  %v2271_v14 = vpack.c.bf16 %v460_v7, %v456_v5  ;;  %v2273_v19 = vpack.c.bf16 %v469_v12, %v465_v10  ;;  %v494_v3 = vld [vmem:[#allocation10 + $0xa00] sm:$0xff]  ;;  %v496_v5 = vld [vmem:[#allocation10 + $0xa10] sm:$0xff]  ;;  %v505_v10 = vld [vmem:[#allocation10 + $0xa58] sm:$0xff] }
 0x13e   :  { %2254 = vmatprep.subr.bf16.mxu1 %v2253_v18  ;;  %v464_v18 = vld [vmem:[#allocation10 + $0x910] sm:$0xff]  ;;  %v498_v4 = vld [vmem:[#allocation10 + $0xa20] sm:$0xff]  ;;  %v509_v12 = vld [vmem:[#allocation10 + $0xa78] sm:$0xff] }
 0x13f   :  { %v500_v7 = vld [vmem:[#allocation10 + $0xa30] sm:$0xff] }
 0x140   :  { %2000 = vmatpush1.bf16.msra.mxu0 %v1999_v26  ;;  %v477_v26 = vld [vmem:[#allocation10 + $0x978] sm:$0xff] }
 0x141   :  { %2256 = vmatpush1.bf16.msra.mxu1 %v2255_v27  ;;  %2002 = vmatprep.subr.bf16.mxu0 %v2001_v28  ;;  %v2019_v27 = vpack.c.bf16 %v466_v17, %v462_v16  ;;  %v2275_v28 = vpack.c.bf16 %v468_v20, %v464_v18  ;;  %v2277_v33 = vpack.c.bf16 %v477_v26, %v473_v24  ;;  %v502_v16 = vld [vmem:[#allocation10 + $0xa40] sm:$0xff]  ;;  %v504_v18 = vld [vmem:[#allocation10 + $0xa50] sm:$0xff]  ;;  %v513_v24 = vld [vmem:[#allocation10 + $0xa98] sm:$0xff] }
 0x142   :  { %2258 = vmatprep.subr.bf16.mxu1 %v2257_v32  ;;  %v472_v32 = vld [vmem:[#allocation10 + $0x950] sm:$0xff]  ;;  %v506_v17 = vld [vmem:[#allocation10 + $0xa60] sm:$0xff]  ;;  %v517_v26 = vld [vmem:[#allocation10 + $0xab8] sm:$0xff] }
 0x143   :  { %888 = vmatmul.mubr.f32.vlgmr.msra.gmra.mrb[0].mxu0 %v3071_v22  ;;  %v508_v20 = vld [vmem:[#allocation10 + $0xa70] sm:$0xff] }
 0x144   :  { %2004 = vmatpush1.bf16.msra.mxu0 %v2003_v38  ;;  %1172 = vmatmul.mubr.f32.vlgmr.msra.gmra.mrb[0].mxu1 %v3071_v22  ;;  %v2267_v22 = vpack.c.bf16 %v452_v59, %v448_v57  ;;  %v485_v38 = vld [vmem:[#allocation10 + $0x9b8] sm:$0xff]  ;;  %v488_v57 = vld [vmem:[#allocation10 + $0x9d0] sm:$0xff] }
 0x145   :  { %2260 = vmatpush1.bf16.msra.mxu1 %v2259_v40  ;;  %2006 = vmatprep.subr.bf16.mxu0 %v2005_v41  ;;  %v2023_v40 = vpack.c.bf16 %v474_v31, %v470_v30  ;;  %v2279_v41 = vpack.c.bf16 %v476_v34, %v472_v32  ;;  %v2281_v47 = vpack.c.bf16 %v485_v38, %v481_v37  ;;  %v492_v59 = vld [vmem:[#allocation10 + $0x9f0] sm:$0xff]  ;;  %v510_v30 = vld [vmem:[#allocation10 + $0xa80] sm:$0xff]  ;;  %v521_v37 = vld [vmem:[#allocation10 + $0xad8] sm:$0xff] }
 0x146   :  { %2262 = vmatprep.subr.bf16.mxu1 %v2261_v46  ;;  %958 = vmatprep.mubr.f32.mxu0 %v742_v52  ;;  %v480_v46 = vld [vmem:[#allocation10 + $0x990] sm:$0xff]  ;;  %v514_v31 = vld [vmem:[#allocation10 + $0xaa0] sm:$0xff]  ;;  %v525_v38 = vld [vmem:[#allocation10 + $0xaf8] sm:$0xff] }
 0x147   :  { %1242 = vmatprep.mubr.f32.mxu1 %v742_v52  ;;  %v493_v52 = vld [vmem:[#allocation10 + $0x9f8] sm:$0xff]  ;;  %v512_v32 = vld [vmem:[#allocation10 + $0xa90] sm:$0xff] }
 0x148   :  { %2008 = vmatpush1.bf16.msra.mxu0 %v2007_v53  ;;  %v2027_v53 = vpack.c.bf16 %v482_v44, %v478_v43  ;;  %v516_v34 = vld [vmem:[#allocation10 + $0xab0] sm:$0xff]  ;;  %v518_v43 = vld [vmem:[#allocation10 + $0xac0] sm:$0xff] }
 0x149   :  { %2264 = vmatpush1.bf16.msra.mxu1 %v2263_v25  ;;  %2010 = vmatprep.subr.bf16.mxu0 %v2009_v54  ;;  %v2283_v25 = vpack.c.bf16 %v484_v48, %v480_v46  ;;  %v2029_v54 = vpack.c.bf16 %v491_v50, %v487_v49  ;;  %v522_v44 = vld [vmem:[#allocation10 + $0xae0] sm:$0xff]  ;;  %v520_v46 = vld [vmem:[#allocation10 + $0xad0] sm:$0xff]  ;;  %v527_v49 = vld [vmem:[#allocation10 + $0xb08] sm:$0xff] }
 0x14a   :  { %2266 = vmatprep.subr.bf16.mxu1 %v2265_v58  ;;  %v2285_v58 = vpack.c.bf16 %v493_v52, %v489_v51  ;;  %v524_v48 = vld [vmem:[#allocation10 + $0xaf0] sm:$0xff]  ;;  %v531_v50 = vld [vmem:[#allocation10 + $0xb28] sm:$0xff]  ;;  %v529_v51 = vld [vmem:[#allocation10 + $0xb18] sm:$0xff] }
 0x14b   :  { %v533_v52 = vld [vmem:[#allocation10 + $0xb38] sm:$0xff] }
 0x14c   :  { %2012 = vmatpush1.bf16.msra.mxu0 %v2011_v1  ;;  %v2031_v1 = vpack.c.bf16 %v490_v56, %v486_v55  ;;  %v526_v55 = vld [vmem:[#allocation10 + $0xb00] sm:$0xff] }
 0x14d   :  { %2268 = vmatpush1.bf16.msra.mxu1 %v2267_v22  ;;  %2014 = vmatprep.subr.bf16.mxu0 %v2013_v2  ;;  %v2287_v22 = vpack.c.bf16 %v492_v59, %v488_v57  ;;  %v2033_v2 = vpack.c.bf16 %v499_v62, %v495_v60  ;;  %v530_v56 = vld [vmem:[#allocation10 + $0xb20] sm:$0xff]  ;;  %v528_v57 = vld [vmem:[#allocation10 + $0xb10] sm:$0xff]  ;;  %v535_v60 = vld [vmem:[#allocation10 + $0xb48] sm:$0xff] }
 0x14e   :  { %2270 = vmatprep.subr.bf16.mxu1 %v2269_v6  ;;  %v2289_v6 = vpack.c.bf16 %v501_v0, %v497_v63  ;;  %v532_v59 = vld [vmem:[#allocation10 + $0xb30] sm:$0xff]  ;;  %v539_v62 = vld [vmem:[#allocation10 + $0xb68] sm:$0xff]  ;;  %v537_v63 = vld [vmem:[#allocation10 + $0xb58] sm:$0xff] }
 0x14f   :  { %v541_v0 = vld [vmem:[#allocation10 + $0xb78] sm:$0xff] }
 0x150   :  { %2016 = vmatpush1.bf16.msra.mxu0 %v2015_v13  ;;  %v2035_v13 = vpack.c.bf16 %v498_v4, %v494_v3  ;;  %v534_v3 = vld [vmem:[#allocation10 + $0xb40] sm:$0xff] }
 0x151   :  { %2272 = vmatpush1.bf16.msra.mxu1 %v2271_v14  ;;  %2018 = vmatprep.subr.bf16.mxu0 %v2017_v15  ;;  %v2291_v14 = vpack.c.bf16 %v500_v7, %v496_v5  ;;  %v2037_v15 = vpack.c.bf16 %v507_v9, %v503_v8  ;;  %v538_v4 = vld [vmem:[#allocation10 + $0xb60] sm:$0xff]  ;;  %v536_v5 = vld [vmem:[#allocation10 + $0xb50] sm:$0xff]  ;;  %v543_v8 = vld [vmem:[#allocation10 + $0xb88] sm:$0xff] }
 0x152   :  { %2274 = vmatprep.subr.bf16.mxu1 %v2273_v19  ;;  %v2293_v19 = vpack.c.bf16 %v509_v12, %v505_v10  ;;  %v540_v7 = vld [vmem:[#allocation10 + $0xb70] sm:$0xff]  ;;  %v547_v9 = vld [vmem:[#allocation10 + $0xba8] sm:$0xff]  ;;  %v545_v10 = vld [vmem:[#allocation10 + $0xb98] sm:$0xff] }
 0x153   :  { %v549_v12 = vld [vmem:[#allocation10 + $0xbb8] sm:$0xff] }
 0x154   :  { %2020 = vmatpush1.bf16.msra.mxu0 %v2019_v27  ;;  %v2039_v27 = vpack.c.bf16 %v506_v17, %v502_v16  ;;  %v542_v16 = vld [vmem:[#allocation10 + $0xb80] sm:$0xff] }
 0x155   :  { %2276 = vmatpush1.bf16.msra.mxu1 %v2275_v28  ;;  %2022 = vmatprep.subr.bf16.mxu0 %v2021_v29  ;;  %v2295_v28 = vpack.c.bf16 %v508_v20, %v504_v18  ;;  %v2041_v29 = vpack.c.bf16 %v515_v23, %v511_v21  ;;  %v546_v17 = vld [vmem:[#allocation10 + $0xba0] sm:$0xff]  ;;  %v544_v18 = vld [vmem:[#allocation10 + $0xb90] sm:$0xff]  ;;  %v551_v21 = vld [vmem:[#allocation10 + $0xbc8] sm:$0xff] }
 0x156   :  { %2278 = vmatprep.subr.bf16.mxu1 %v2277_v33  ;;  %v2297_v33 = vpack.c.bf16 %v517_v26, %v513_v24  ;;  %v548_v20 = vld [vmem:[#allocation10 + $0xbb0] sm:$0xff]  ;;  %v555_v23 = vld [vmem:[#allocation10 + $0xbe8] sm:$0xff]  ;;  %v553_v24 = vld [vmem:[#allocation10 + $0xbd8] sm:$0xff] }
 0x157   :  { %v557_v26 = vld [vmem:[#allocation10 + $0xbf8] sm:$0xff] }
 0x158   :  { %2024 = vmatpush1.bf16.msra.mxu0 %v2023_v40  ;;  %v2043_v40 = vpack.c.bf16 %v514_v31, %v510_v30  ;;  %v550_v30 = vld [vmem:[#allocation10 + $0xbc0] sm:$0xff] }
 0x159   :  { %2280 = vmatpush1.bf16.msra.mxu1 %v2279_v41  ;;  %2026 = vmatprep.subr.bf16.mxu0 %v2025_v42  ;;  %v2299_v41 = vpack.c.bf16 %v516_v34, %v512_v32  ;;  %v2045_v42 = vpack.c.bf16 %v523_v36, %v519_v35  ;;  %v554_v31 = vld [vmem:[#allocation10 + $0xbe0] sm:$0xff]  ;;  %v552_v32 = vld [vmem:[#allocation10 + $0xbd0] sm:$0xff]  ;;  %v559_v35 = vld [vmem:[#allocation10 + $0xc08] sm:$0xff] }
 0x15a   :  { %2282 = vmatprep.subr.bf16.mxu1 %v2281_v47  ;;  %v2301_v47 = vpack.c.bf16 %v525_v38, %v521_v37  ;;  %v556_v34 = vld [vmem:[#allocation10 + $0xbf0] sm:$0xff]  ;;  %v563_v36 = vld [vmem:[#allocation10 + $0xc28] sm:$0xff]  ;;  %v727_v37 = vcombine.high %v3077_v39, %v3077_v39  ;;  %v561_v38 = vld [vmem:[#allocation10 + $0xc18] sm:$0xff] }
 0x15b   :  { %v569_v39 = vld [vmem:[#allocation10 + $0xc58] sm:$0xff] }
 0x15c   :  { %2028 = vmatpush1.bf16.msra.mxu0 %v2027_v53  ;;  %v2047_v53 = vpack.c.bf16 %v522_v44, %v518_v43  ;;  %v2065_v43 = vpack.c.bf16 %v563_v36, %v559_v35  ;;  %v558_v44 = vld [vmem:[#allocation10 + $0xc00] sm:$0xff]  ;;  %v599_v35 = vld [vmem:[#allocation10 + $0xd48] sm:$0xff] }
 0x15d   :  { %2284 = vmatpush1.bf16.msra.mxu1 %v2283_v25  ;;  %2030 = vmatprep.subr.bf16.mxu0 %v2029_v54  ;;  %v2303_v25 = vpack.c.bf16 %v524_v48, %v520_v46  ;;  %v2049_v54 = vpack.c.bf16 %v531_v50, %v527_v49  ;;  %v562_v46 = vld [vmem:[#allocation10 + $0xc20] sm:$0xff]  ;;  %v564_v49 = vld [vmem:[#allocation10 + $0xc30] sm:$0xff]  ;;  %v567_v50 = vld [vmem:[#allocation10 + $0xc48] sm:$0xff] }
 0x15e   :  { %2286 = vmatprep.subr.bf16.mxu1 %v2285_v58  ;;  %v2305_v58 = vpack.c.bf16 %v533_v52, %v529_v51  ;;  %v571_v51 = vld [vmem:[#allocation10 + $0xc68] sm:$0xff]  ;;  %v3090_v52 = vrot.slane %v727_v37, %v3058_v11  ;;  %v601_v37 = vld [vmem:[#allocation10 + $0xd58] sm:$0xff] }
 0x15f   :  { %v603_v36 = vld [vmem:[#allocation10 + $0xd68] sm:$0xff] }
 0x160   :  { %2032 = vmatpush1.bf16.msra.mxu0 %v2031_v1  ;;  %v2051_v1 = vpack.c.bf16 %v530_v56, %v526_v55  ;;  %v2069_v55 = vpack.c.bf16 %v571_v51, %v567_v50  ;;  %v566_v56 = vld [vmem:[#allocation10 + $0xc40] sm:$0xff]  ;;  %v743_v11 = vcombine.high %v3090_v52, %v3090_v52  ;;  %v611_v50 = vld [vmem:[#allocation10 + $0xda8] sm:$0xff]  ;;  %v609_v51 = vld [vmem:[#allocation10 + $0xd98] sm:$0xff] }
 0x161   :  { %2288 = vmatpush1.bf16.msra.mxu1 %v2287_v22  ;;  %2034 = vmatprep.subr.bf16.mxu0 %v2033_v2  ;;  %v2307_v22 = vpack.c.bf16 %v532_v59, %v528_v57  ;;  %v2053_v2 = vpack.c.bf16 %v539_v62, %v535_v60  ;;  %v570_v57 = vld [vmem:[#allocation10 + $0xc60] sm:$0xff]  ;;  %v572_v60 = vld [vmem:[#allocation10 + $0xc70] sm:$0xff]  ;;  %v575_v62 = vld [vmem:[#allocation10 + $0xc88] sm:$0xff] }
 0x162   :  { %2290 = vmatprep.subr.bf16.mxu1 %v2289_v6  ;;  %v2309_v6 = vpack.c.bf16 %v541_v0, %v537_v63  ;;  %v579_v63 = vld [vmem:[#allocation10 + $0xca8] sm:$0xff]  ;;  %v577_v0 = vld [vmem:[#allocation10 + $0xc98] sm:$0xff] }
 0x164   :  { %2036 = vmatpush1.bf16.msra.mxu0 %v2035_v13  ;;  %v2055_v13 = vpack.c.bf16 %v538_v4, %v534_v3  ;;  %v2073_v3 = vpack.c.bf16 %v579_v63, %v575_v62  ;;  %v574_v4 = vld [vmem:[#allocation10 + $0xc80] sm:$0xff]  ;;  %v619_v62 = vld [vmem:[#allocation10 + $0xde8] sm:$0xff]  ;;  %v617_v63 = vld [vmem:[#allocation10 + $0xdd8] sm:$0xff] }
 0x165   :  { %2292 = vmatpush1.bf16.msra.mxu1 %v2291_v14  ;;  %2038 = vmatprep.subr.bf16.mxu0 %v2037_v15  ;;  %v2311_v14 = vpack.c.bf16 %v540_v7, %v536_v5  ;;  %v2057_v15 = vpack.c.bf16 %v547_v9, %v543_v8  ;;  %v578_v5 = vld [vmem:[#allocation10 + $0xca0] sm:$0xff]  ;;  %v580_v8 = vld [vmem:[#allocation10 + $0xcb0] sm:$0xff]  ;;  %v583_v9 = vld [vmem:[#allocation10 + $0xcc8] sm:$0xff] }
 0x166   :  { %2294 = vmatprep.subr.bf16.mxu1 %v2293_v19  ;;  %v2313_v19 = vpack.c.bf16 %v549_v12, %v545_v10  ;;  %v587_v10 = vld [vmem:[#allocation10 + $0xce8] sm:$0xff]  ;;  %v585_v12 = vld [vmem:[#allocation10 + $0xcd8] sm:$0xff] }
 0x168   :  { %2040 = vmatpush1.bf16.msra.mxu0 %v2039_v27  ;;  %v2059_v27 = vpack.c.bf16 %v546_v17, %v542_v16  ;;  %v582_v16 = vld [vmem:[#allocation10 + $0xcc0] sm:$0xff] }
 0x169   :  { %2296 = vmatpush1.bf16.msra.mxu1 %v2295_v28  ;;  %2042 = vmatprep.subr.bf16.mxu0 %v2041_v29  ;;  %v2315_v28 = vpack.c.bf16 %v548_v20, %v544_v18  ;;  %v2061_v29 = vpack.c.bf16 %v555_v23, %v551_v21  ;;  %v586_v17 = vld [vmem:[#allocation10 + $0xce0] sm:$0xff]  ;;  %v584_v18 = vld [vmem:[#allocation10 + $0xcd0] sm:$0xff]  ;;  %v591_v21 = vld [vmem:[#allocation10 + $0xd08] sm:$0xff] }
 0x16a   :  { %2298 = vmatprep.subr.bf16.mxu1 %v2297_v33  ;;  %v2317_v33 = vpack.c.bf16 %v557_v26, %v553_v24  ;;  %v588_v20 = vld [vmem:[#allocation10 + $0xcf0] sm:$0xff]  ;;  %v595_v23 = vld [vmem:[#allocation10 + $0xd28] sm:$0xff]  ;;  %v593_v24 = vld [vmem:[#allocation10 + $0xd18] sm:$0xff] }
 0x16b   :  { %v597_v26 = vld [vmem:[#allocation10 + $0xd38] sm:$0xff] }
 0x16c   :  { %2044 = vmatpush1.bf16.msra.mxu0 %v2043_v40  ;;  %v565_v40 = vld [vmem:[#allocation10 + $0xc38] sm:$0xff] }
 0x16d   :  { %2300 = vmatpush1.bf16.msra.mxu1 %v2299_v41  ;;  %2046 = vmatprep.subr.bf16.mxu0 %v2045_v42  ;;  %v2063_v41 = vpack.c.bf16 %v554_v31, %v550_v30  ;;  %v2319_v42 = vpack.c.bf16 %v556_v34, %v552_v32  ;;  %v2321_v48 = vpack.c.bf16 %v565_v40, %v561_v38  ;;  %v590_v30 = vld [vmem:[#allocation10 + $0xd00] sm:$0xff]  ;;  %v592_v32 = vld [vmem:[#allocation10 + $0xd10] sm:$0xff]  ;;  %v605_v38 = vld [vmem:[#allocation10 + $0xd78] sm:$0xff] }
 0x16e   :  { %2302 = vmatprep.subr.bf16.mxu1 %v2301_v47  ;;  %v560_v47 = vld [vmem:[#allocation10 + $0xc10] sm:$0xff]  ;;  %v594_v31 = vld [vmem:[#allocation10 + $0xd20] sm:$0xff] }
 0x16f   :  { %v596_v34 = vld [vmem:[#allocation10 + $0xd30] sm:$0xff]  ;;  %v2083_v40 = vpack.c.bf16 %v594_v31, %v590_v30 }
 0x170   :  { %2048 = vmatpush1.bf16.msra.mxu0 %v2047_v53  ;;  %v573_v53 = vld [vmem:[#allocation10 + $0xc78] sm:$0xff]  ;;  %v632_v30 = vld [vmem:[#allocation10 + $0xe50] sm:$0xff] }
 0x171   :  { %2304 = vmatpush1.bf16.msra.mxu1 %v2303_v25  ;;  %2050 = vmatprep.subr.bf16.mxu0 %v2049_v54  ;;  %v2067_v25 = vpack.c.bf16 %v562_v46, %v558_v44  ;;  %v2323_v54 = vpack.c.bf16 %v564_v49, %v560_v47  ;;  %v2325_v59 = vpack.c.bf16 %v573_v53, %v569_v39  ;;  %v602_v44 = vld [vmem:[#allocation10 + $0xd60] sm:$0xff]  ;;  %v600_v46 = vld [vmem:[#allocation10 + $0xd50] sm:$0xff]  ;;  %v607_v49 = vld [vmem:[#allocation10 + $0xd88] sm:$0xff] }
 0x172   :  { %2306 = vmatprep.subr.bf16.mxu1 %v2305_v58  ;;  %v568_v58 = vld [vmem:[#allocation10 + $0xc50] sm:$0xff]  ;;  %v2341_v47 = vpack.c.bf16 %v605_v38, %v601_v37  ;;  %v613_v39 = vld [vmem:[#allocation10 + $0xdb8] sm:$0xff] }
 0x174   :  { %2052 = vmatpush1.bf16.msra.mxu0 %v2051_v1  ;;  %v581_v1 = vld [vmem:[#allocation10 + $0xcb8] sm:$0xff] }
 0x175   :  { %2308 = vmatpush1.bf16.msra.mxu1 %v2307_v22  ;;  %2054 = vmatprep.subr.bf16.mxu0 %v2053_v2  ;;  %v2071_v22 = vpack.c.bf16 %v570_v57, %v566_v56  ;;  %v2327_v2 = vpack.c.bf16 %v572_v60, %v568_v58  ;;  %v2329_v7 = vpack.c.bf16 %v581_v1, %v577_v0  ;;  %v610_v56 = vld [vmem:[#allocation10 + $0xda0] sm:$0xff]  ;;  %v608_v57 = vld [vmem:[#allocation10 + $0xd90] sm:$0xff]  ;;  %v615_v60 = vld [vmem:[#allocation10 + $0xdc8] sm:$0xff] }
 0x176   :  { %2310 = vmatprep.subr.bf16.mxu1 %v2309_v6  ;;  %v576_v6 = vld [vmem:[#allocation10 + $0xc90] sm:$0xff]  ;;  %v2345_v58 = vpack.c.bf16 %v613_v39, %v609_v51 }
 0x178   :  { %2056 = vmatpush1.bf16.msra.mxu0 %v2055_v13  ;;  %v589_v13 = vld [vmem:[#allocation10 + $0xcf8] sm:$0xff] }
 0x179   :  { %2312 = vmatpush1.bf16.msra.mxu1 %v2311_v14  ;;  %2058 = vmatprep.subr.bf16.mxu0 %v2057_v15  ;;  %v2075_v14 = vpack.c.bf16 %v578_v5, %v574_v4  ;;  %v2077_v15 = vpack.c.bf16 %v587_v10, %v583_v9  ;;  %v616_v4 = vld [vmem:[#allocation10 + $0xdd0] sm:$0xff]  ;;  %v625_v9 = vld [vmem:[#allocation10 + $0xe18] sm:$0xff] }
 0x17a   :  { %2314 = vmatprep.subr.bf16.mxu1 %v2313_v19  ;;  %v2333_v19 = vpack.c.bf16 %v589_v13, %v585_v12  ;;  %v629_v10 = vld [vmem:[#allocation10 + $0xe38] sm:$0xff] }
 0x17c   :  { %2060 = vmatpush1.bf16.msra.mxu0 %v2059_v27  ;;  %v2079_v27 = vpack.c.bf16 %v586_v17, %v582_v16  ;;  %v624_v16 = vld [vmem:[#allocation10 + $0xe10] sm:$0xff]  ;;  %v2353_v17 = vpack.c.bf16 %v629_v10, %v625_v9 }
 0x17d   :  { %2316 = vmatpush1.bf16.msra.mxu1 %v2315_v28  ;;  %2062 = vmatprep.subr.bf16.mxu0 %v2061_v29  ;;  %v2335_v28 = vpack.c.bf16 %v588_v20, %v584_v18  ;;  %v2081_v29 = vpack.c.bf16 %v595_v23, %v591_v21  ;;  %v628_v18 = vld [vmem:[#allocation10 + $0xe30] sm:$0xff]  ;;  %v635_v20 = vld [vmem:[#allocation10 + $0xe68] sm:$0xff]  ;;  %v633_v21 = vld [vmem:[#allocation10 + $0xe58] sm:$0xff] }
 0x17e   :  { %2318 = vmatprep.subr.bf16.mxu1 %v2317_v33  ;;  %v2337_v33 = vpack.c.bf16 %v597_v26, %v593_v24  ;;  %v637_v23 = vld [vmem:[#allocation10 + $0xe78] sm:$0xff]  ;;  %v2355_v26 = vpack.c.bf16 %v628_v18, %v624_v16  ;;  %v668_v16 = vld [vmem:[#allocation10 + $0xf70] sm:$0xff]  ;;  %v675_v18 = vld [vmem:[#allocation10 + $0xfa8] sm:$0xff] }
 0x17f   :  { %v2357_v31 = vpack.c.bf16 %v637_v23, %v633_v21 }
 0x180   :  { %2064 = vmatpush1.bf16.msra.mxu0 %v2063_v41  ;;  %v2339_v41 = vpack.c.bf16 %v596_v34, %v592_v32  ;;  %v636_v32 = vld [vmem:[#allocation10 + $0xe70] sm:$0xff]  ;;  %v643_v34 = vld [vmem:[#allocation10 + $0xea8] sm:$0xff] }
 0x181   :  { %2320 = vmatpush1.bf16.msra.mxu1 %v2319_v42  ;;  %2066 = vmatprep.subr.bf16.mxu0 %v2065_v43  ;;  %v2085_v42 = vpack.c.bf16 %v603_v36, %v599_v35  ;;  %v598_v43 = vld [vmem:[#allocation10 + $0xd40] sm:$0xff]  ;;  %v641_v35 = vld [vmem:[#allocation10 + $0xe98] sm:$0xff]  ;;  %v2359_v38 = vpack.c.bf16 %v636_v32, %v632_v30  ;;  %v676_v30 = vld [vmem:[#allocation10 + $0xfb0] sm:$0xff] }
 0x182   :  { %2322 = vmatprep.subr.bf16.mxu1 %v2321_v48  ;;  %v604_v48 = vld [vmem:[#allocation10 + $0xd70] sm:$0xff]  ;;  %v2087_v53 = vpack.c.bf16 %v602_v44, %v598_v43  ;;  %v645_v36 = vld [vmem:[#allocation10 + $0xeb8] sm:$0xff]  ;;  %v683_v32 = vld [vmem:[#allocation10 + $0xfe8] sm:$0xff] }
 0x183   :  { %959 = vmatmul.mubr.f32.vlgmr.msra.gmra.mrb[0].mxu0 %v3081_v45  ;;  %v640_v43 = vld [vmem:[#allocation10 + $0xe90] sm:$0xff]  ;;  %v2361_v44 = vpack.c.bf16 %v645_v36, %v641_v35 }
 0x184   :  { %2068 = vmatpush1.bf16.msra.mxu0 %v2067_v25  ;;  %1243 = vmatmul.mubr.f32.vlgmr.msra.gmra.mrb[0].mxu1 %v3081_v45  ;;  %v2331_v45 = vpack.c.bf16 %v580_v8, %v576_v6  ;;  %v2343_v25 = vpack.c.bf16 %v604_v48, %v600_v46  ;;  %v620_v6 = vld [vmem:[#allocation10 + $0xdf0] sm:$0xff]  ;;  %v627_v8 = vld [vmem:[#allocation10 + $0xe28] sm:$0xff] }
 0x185   :  { %2324 = vmatpush1.bf16.msra.mxu1 %v2323_v54  ;;  %2070 = vmatprep.subr.bf16.mxu0 %v2069_v55  ;;  %v2089_v54 = vpack.c.bf16 %v611_v50, %v607_v49  ;;  %v606_v55 = vld [vmem:[#allocation10 + $0xd80] sm:$0xff]  ;;  %v2351_v13 = vpack.c.bf16 %v620_v6, %v616_v4  ;;  %v644_v46 = vld [vmem:[#allocation10 + $0xeb0] sm:$0xff]  ;;  %v651_v48 = vld [vmem:[#allocation10 + $0xee8] sm:$0xff] }
 0x186   :  { %2326 = vmatprep.subr.bf16.mxu1 %v2325_v59  ;;  %1029 = vmatprep.mubr.f32.mxu0 %v743_v11  ;;  %v612_v59 = vld [vmem:[#allocation10 + $0xdb0] sm:$0xff]  ;;  %v2091_v0 = vpack.c.bf16 %v610_v56, %v606_v55  ;;  %v649_v49 = vld [vmem:[#allocation10 + $0xed8] sm:$0xff]  ;;  %v2363_v39 = vpack.c.bf16 %v644_v46, %v640_v43  ;;  %v667_v6 = vld [vmem:[#allocation10 + $0xf68] sm:$0xff] }
 0x187   :  { %1313 = vmatprep.mubr.f32.mxu1 %v743_v11  ;;  %v621_v11 = vld [vmem:[#allocation10 + $0xdf8] sm:$0xff]  ;;  %v2347_v1 = vpack.c.bf16 %v612_v59, %v608_v57  ;;  %v648_v55 = vld [vmem:[#allocation10 + $0xed0] sm:$0xff]  ;;  %v659_v59 = vld [vmem:[#allocation10 + $0xf28] sm:$0xff] }
 0x188   :  { %2072 = vmatpush1.bf16.msra.mxu0 %v2071_v22  ;;  %v2093_v22 = vpack.c.bf16 %v619_v62, %v615_v60  ;;  %v2349_v5 = vpack.c.bf16 %v621_v11, %v617_v63  ;;  %v653_v50 = vld [vmem:[#allocation10 + $0xef8] sm:$0xff]  ;;  %v652_v57 = vld [vmem:[#allocation10 + $0xef0] sm:$0xff]  ;;  %v1326_v46 = vld [vmem:[#allocation12 + $0x28] sm:$0xff] }
 0x189   :  { %2328 = vmatpush1.bf16.msra.mxu1 %v2327_v2  ;;  %2074 = vmatprep.subr.bf16.mxu0 %v2073_v3  ;;  %v614_v2 = vld [vmem:[#allocation10 + $0xdc0] sm:$0xff]  ;;  %v2365_v56 = vpack.c.bf16 %v653_v50, %v649_v49  ;;  %v657_v60 = vld [vmem:[#allocation10 + $0xf18] sm:$0xff]  ;;  %v2367_v11 = vpack.c.bf16 %v652_v57, %v648_v55  ;;  %v660_v4 = vld [vmem:[#allocation10 + $0xf30] sm:$0xff] }
 0x18a   :  { %2330 = vmatprep.subr.bf16.mxu1 %v2329_v7  ;;  %v618_v3 = vld [vmem:[#allocation10 + $0xde0] sm:$0xff]  ;;  %v623_v7 = vld [vmem:[#allocation10 + $0xe08] sm:$0xff]  ;;  %v661_v62 = vld [vmem:[#allocation10 + $0xf38] sm:$0xff] }
 0x18b   :  { %v2095_v12 = vpack.c.bf16 %v618_v3, %v614_v2  ;;  %v656_v2 = vld [vmem:[#allocation10 + $0xf10] sm:$0xff]  ;;  %v2369_v3 = vpack.c.bf16 %v661_v62, %v657_v60  ;;  %v1334_v57 = vld [vmem:[#allocation12 + $0x68] sm:$0xff]  ;;  %v3096_v60 = vld.sshfl [vmem:[#allocation7] sm:$0x33 pattern:$0x76325410] }
 0x18c   :  { %2076 = vmatpush1.bf16.msra.mxu0 %v2075_v14  ;;  %v2097_v14 = vpack.c.bf16 %v627_v8, %v623_v7  ;;  %v665_v7 = vld [vmem:[#allocation10 + $0xf58] sm:$0xff]  ;;  %v2371_v10 = vpack.c.bf16 %v660_v4, %v656_v2  ;;  %v684_v43 = vld [vmem:[#allocation10 + $0xff0] sm:$0xff]  ;;  %v1338_v4 = vld [vmem:[#allocation12 + $0x88] sm:$0xff] }
 0x18d   :  { %2332 = vmatpush1.bf16.msra.mxu1 %v2331_v45  ;;  %2078 = vmatprep.subr.bf16.mxu0 %v2077_v15  ;;  %v622_v45 = vld [vmem:[#allocation10 + $0xe00] sm:$0xff]  ;;  %v669_v8 = vld [vmem:[#allocation10 + $0xf78] sm:$0xff]  ;;  %v1327_v55 = vld [vmem:[#allocation12 + $0x30] sm:$0xff] }
 0x18e   :  { %2334 = vmatprep.subr.bf16.mxu1 %v2333_v19  ;;  %v626_v15 = vld [vmem:[#allocation10 + $0xe20] sm:$0xff]  ;;  %v631_v19 = vld [vmem:[#allocation10 + $0xe48] sm:$0xff] }
 0x18f   :  { %v2099_v24 = vpack.c.bf16 %v626_v15, %v622_v45  ;;  %v664_v45 = vld [vmem:[#allocation10 + $0xf50] sm:$0xff]  ;;  %v2373_v15 = vpack.c.bf16 %v669_v8, %v665_v7  ;;  %v1340_v7 = vld [vmem:[#allocation12 + $0x98] sm:$0xff] }
 0x190   :  { %2080 = vmatpush1.bf16.msra.mxu0 %v2079_v27  ;;  %v2101_v27 = vpack.c.bf16 %v635_v20, %v631_v19  ;;  %v673_v19 = vld [vmem:[#allocation10 + $0xf98] sm:$0xff]  ;;  %v2375_v23 = vpack.c.bf16 %v668_v16, %v664_v45  ;;  %v1339_v45 = vld [vmem:[#allocation12 + $0x90] sm:$0xff] }
 0x191   :  { %2336 = vmatpush1.bf16.msra.mxu1 %v2335_v28  ;;  %2082 = vmatprep.subr.bf16.mxu0 %v2081_v29  ;;  %v630_v28 = vld [vmem:[#allocation10 + $0xe40] sm:$0xff]  ;;  %v677_v20 = vld [vmem:[#allocation10 + $0xfb8] sm:$0xff]  ;;  %v1343_v16 = vld [vmem:[#allocation12 + $0xb0] sm:$0xff] }
 0x192   :  { %2338 = vmatprep.subr.bf16.mxu1 %v2337_v33  ;;  %v634_v29 = vld [vmem:[#allocation10 + $0xe60] sm:$0xff]  ;;  %v639_v33 = vld [vmem:[#allocation10 + $0xe88] sm:$0xff]  ;;  %v1344_v8 = vld [vmem:[#allocation12 + $0xb8] sm:$0xff] }
 0x193   :  { %v2103_v37 = vpack.c.bf16 %v634_v29, %v630_v28  ;;  %v672_v28 = vld [vmem:[#allocation10 + $0xf90] sm:$0xff]  ;;  %v2377_v29 = vpack.c.bf16 %v677_v20, %v673_v19  ;;  %v1348_v19 = vld [vmem:[#allocation12 + $0xd8] sm:$0xff] }
 0x194   :  { %2084 = vmatpush1.bf16.msra.mxu0 %v2083_v40  ;;  %v2105_v40 = vpack.c.bf16 %v643_v34, %v639_v33  ;;  %v681_v33 = vld [vmem:[#allocation10 + $0xfd8] sm:$0xff]  ;;  %v2379_v36 = vpack.c.bf16 %v676_v30, %v672_v28  ;;  %v1354_v30 = vld [vmem:[#allocation12 + $0x108] sm:$0xff] }
 0x195   :  { %2340 = vmatpush1.bf16.msra.mxu1 %v2339_v41  ;;  %2086 = vmatprep.subr.bf16.mxu0 %v2085_v42  ;;  %v638_v41 = vld [vmem:[#allocation10 + $0xe80] sm:$0xff]  ;;  %v685_v34 = vld [vmem:[#allocation10 + $0xff8] sm:$0xff] }
 0x196   :  { %2342 = vmatprep.subr.bf16.mxu1 %v2341_v47  ;;  %v642_v42 = vld [vmem:[#allocation10 + $0xea0] sm:$0xff]  ;;  %v647_v47 = vld [vmem:[#allocation10 + $0xec8] sm:$0xff]  ;;  %v1352_v20 = vld [vmem:[#allocation12 + $0xf8] sm:$0xff] }
 0x197   :  { %v2107_v51 = vpack.c.bf16 %v642_v42, %v638_v41  ;;  %v680_v41 = vld [vmem:[#allocation10 + $0xfd0] sm:$0xff]  ;;  %v2381_v42 = vpack.c.bf16 %v685_v34, %v681_v33  ;;  %v2461_v28 = vpack.c.bf16 %v1352_v20, %v1348_v19  ;;  %v1360_v33 = vld [vmem:[#allocation12 + $0x138] sm:$0xff] }
 0x198   :  { %2088 = vmatpush1.bf16.msra.mxu0 %v2087_v53  ;;  %v2109_v53 = vpack.c.bf16 %v651_v48, %v647_v47  ;;  %v1324_v47 = vld [vmem:[#allocation12 + $0x18] sm:$0xff]  ;;  %v2383_v50 = vpack.c.bf16 %v684_v43, %v680_v41  ;;  %v1362_v43 = vld [vmem:[#allocation12 + $0x148] sm:$0xff] }
 0x199   :  { %2344 = vmatpush1.bf16.msra.mxu1 %v2343_v25  ;;  %2090 = vmatprep.subr.bf16.mxu0 %v2089_v54  ;;  %v646_v25 = vld [vmem:[#allocation10 + $0xec0] sm:$0xff]  ;;  %v1328_v48 = vld [vmem:[#allocation12 + $0x38] sm:$0xff] }
 0x19a   :  { %2346 = vmatprep.subr.bf16.mxu1 %v2345_v58  ;;  %v650_v54 = vld [vmem:[#allocation10 + $0xee0] sm:$0xff]  ;;  %v655_v58 = vld [vmem:[#allocation10 + $0xf08] sm:$0xff] }
 0x19b   :  { %v2111_v63 = vpack.c.bf16 %v650_v54, %v646_v25  ;;  %v1323_v25 = vld [vmem:[#allocation12 + $0x10] sm:$0xff]  ;;  %v2449_v54 = vpack.c.bf16 %v1328_v48, %v1324_v47  ;;  %v1368_v47 = vld [vmem:[#allocation12 + $0x178] sm:$0xff] }
 0x19c   :  { %2092 = vmatpush1.bf16.msra.mxu0 %v2091_v0  ;;  %v2113_v0 = vpack.c.bf16 %v659_v59, %v655_v58  ;;  %v1332_v58 = vld [vmem:[#allocation12 + $0x58] sm:$0xff] }
 0x19d   :  { %2348 = vmatpush1.bf16.msra.mxu1 %v2347_v1  ;;  %2094 = vmatprep.subr.bf16.mxu0 %v2093_v22  ;;  %v654_v1 = vld [vmem:[#allocation10 + $0xf00] sm:$0xff]  ;;  %v1336_v59 = vld [vmem:[#allocation12 + $0x78] sm:$0xff] }
 0x19e   :  { %2350 = vmatprep.subr.bf16.mxu1 %v2349_v5  ;;  %v658_v22 = vld [vmem:[#allocation10 + $0xf20] sm:$0xff]  ;;  %v663_v5 = vld [vmem:[#allocation10 + $0xf48] sm:$0xff]  ;;  %v2453_v2 = vpack.c.bf16 %v1336_v59, %v1332_v58  ;;  %v1376_v58 = vld [vmem:[#allocation12 + $0x1b8] sm:$0xff] }
 0x19f   :  { %v2115_v9 = vpack.c.bf16 %v658_v22, %v654_v1  ;;  %v1333_v1 = vld [vmem:[#allocation12 + $0x60] sm:$0xff]  ;;  %v1331_v22 = vld [vmem:[#allocation12 + $0x50] sm:$0xff] }
 0x1a0   :  { %2096 = vmatpush1.bf16.msra.mxu0 %v2095_v12  ;;  %v2117_v12 = vpack.c.bf16 %v667_v6, %v663_v5  ;;  %v1342_v5 = vld [vmem:[#allocation12 + $0xa8] sm:$0xff]  ;;  %v1479_v6 = vcombine.high %v3096_v60, %v3096_v60 }
 0x1a1   :  { %2352 = vmatpush1.bf16.msra.mxu1 %v2351_v13  ;;  %2098 = vmatprep.subr.bf16.mxu0 %v2097_v14  ;;  %v662_v13 = vld [vmem:[#allocation10 + $0xf40] sm:$0xff] }
 0x1a2   :  { %2354 = vmatprep.subr.bf16.mxu1 %v2353_v17  ;;  %v666_v14 = vld [vmem:[#allocation10 + $0xf60] sm:$0xff]  ;;  %v671_v17 = vld [vmem:[#allocation10 + $0xf88] sm:$0xff] }
 0x1a3   :  { %v2119_v21 = vpack.c.bf16 %v666_v14, %v662_v13  ;;  %v1337_v13 = vld [vmem:[#allocation12 + $0x80] sm:$0xff] }
 0x1a4   :  { %2100 = vmatpush1.bf16.msra.mxu0 %v2099_v24  ;;  %v2121_v24 = vpack.c.bf16 %v675_v18, %v671_v17  ;;  %v1341_v14 = vld [vmem:[#allocation12 + $0xa0] sm:$0xff]  ;;  %v1346_v17 = vld [vmem:[#allocation12 + $0xc8] sm:$0xff] }
 0x1a5   :  { %2356 = vmatpush1.bf16.msra.mxu1 %v2355_v26  ;;  %2102 = vmatprep.subr.bf16.mxu0 %v2101_v27  ;;  %v670_v26 = vld [vmem:[#allocation10 + $0xf80] sm:$0xff]  ;;  %v1350_v18 = vld [vmem:[#allocation12 + $0xe8] sm:$0xff] }
 0x1a6   :  { %2358 = vmatprep.subr.bf16.mxu1 %v2357_v31  ;;  %v674_v27 = vld [vmem:[#allocation10 + $0xfa0] sm:$0xff]  ;;  %v679_v31 = vld [vmem:[#allocation10 + $0xfc8] sm:$0xff] }
 0x1a7   :  { %v2123_v35 = vpack.c.bf16 %v674_v27, %v670_v26  ;;  %v1349_v26 = vld [vmem:[#allocation12 + $0xe0] sm:$0xff]  ;;  %v1347_v27 = vld [vmem:[#allocation12 + $0xd0] sm:$0xff] }
 0x1a8   :  { %2104 = vmatpush1.bf16.msra.mxu0 %v2103_v37  ;;  %v2125_v37 = vpack.c.bf16 %v683_v32, %v679_v31  ;;  %v1358_v31 = vld [vmem:[#allocation12 + $0x128] sm:$0xff]  ;;  %v1356_v32 = vld [vmem:[#allocation12 + $0x118] sm:$0xff] }
 0x1a9   :  { %2360 = vmatpush1.bf16.msra.mxu1 %v2359_v38  ;;  %2106 = vmatprep.subr.bf16.mxu0 %v2105_v40  ;;  %v678_v38 = vld [vmem:[#allocation10 + $0xfc0] sm:$0xff]  ;;  %v2465_v41 = vpack.c.bf16 %v1360_v33, %v1356_v32 }
 0x1aa   :  { %2362 = vmatprep.subr.bf16.mxu1 %v2361_v44  ;;  %v682_v40 = vld [vmem:[#allocation10 + $0xfe0] sm:$0xff]  ;;  %v1322_v44 = vld [vmem:[#allocation12 + $0x8] sm:$0xff] }
 0x1ab   :  { %v2127_v49 = vpack.c.bf16 %v682_v40, %v678_v38  ;;  %v1357_v38 = vld [vmem:[#allocation12 + $0x120] sm:$0xff]  ;;  %v1355_v40 = vld [vmem:[#allocation12 + $0x110] sm:$0xff] }
 0x1ac   :  { %2108 = vmatpush1.bf16.msra.mxu0 %v2107_v51  ;;  %v2385_v51 = vpack.c.bf16 %v1326_v46, %v1322_v44  ;;  %v1366_v44 = vld [vmem:[#allocation12 + $0x168] sm:$0xff]  ;;  %v1364_v46 = vld [vmem:[#allocation12 + $0x158] sm:$0xff] }
 0x1ad   :  { %2364 = vmatpush1.bf16.msra.mxu1 %v2363_v39  ;;  %2110 = vmatprep.subr.bf16.mxu0 %v2109_v53  ;;  %v1321_v39 = vld [vmem:[#allocation12] sm:$0xff] }
 0x1ae   :  { %2366 = vmatprep.subr.bf16.mxu1 %v2365_v56  ;;  %v1325_v53 = vld [vmem:[#allocation12 + $0x20] sm:$0xff]  ;;  %v1330_v56 = vld [vmem:[#allocation12 + $0x48] sm:$0xff] }
 0x1af   :  { %v2387_v62 = vpack.c.bf16 %v1325_v53, %v1321_v39  ;;  %v1365_v39 = vld [vmem:[#allocation12 + $0x160] sm:$0xff]  ;;  %v1363_v53 = vld [vmem:[#allocation12 + $0x150] sm:$0xff] }
 0x1b0   :  { %2112 = vmatpush1.bf16.msra.mxu0 %v2111_v63  ;;  %v2451_v63 = vpack.c.bf16 %v1327_v55, %v1323_v25  ;;  %v2469_v25 = vpack.c.bf16 %v1368_v47, %v1364_v46  ;;  %v1370_v55 = vld [vmem:[#allocation12 + $0x188] sm:$0xff] }
 0x1b1   :  { %2368 = vmatpush1.bf16.msra.mxu1 %v2367_v11  ;;  %2114 = vmatprep.subr.bf16.mxu0 %v2113_v0  ;;  %v2389_v11 = vpack.c.bf16 %v1334_v57, %v1330_v56  ;;  %v1329_v0 = vld [vmem:[#allocation12 + $0x40] sm:$0xff]  ;;  %v1374_v56 = vld [vmem:[#allocation12 + $0x1a8] sm:$0xff]  ;;  %v1372_v57 = vld [vmem:[#allocation12 + $0x198] sm:$0xff] }
 0x1b2   :  { %2370 = vmatprep.subr.bf16.mxu1 %v2369_v3  ;;  %v1335_v3 = vld [vmem:[#allocation12 + $0x70] sm:$0xff] }
 0x1b4   :  { %2116 = vmatpush1.bf16.msra.mxu0 %v2115_v9  ;;  %v2391_v9 = vpack.c.bf16 %v1333_v1, %v1329_v0  ;;  %v1373_v0 = vld [vmem:[#allocation12 + $0x1a0] sm:$0xff]  ;;  %v1371_v1 = vld [vmem:[#allocation12 + $0x190] sm:$0xff] }
 0x1b5   :  { %2372 = vmatpush1.bf16.msra.mxu1 %v2371_v10  ;;  %2118 = vmatprep.subr.bf16.mxu0 %v2117_v12  ;;  %v2455_v10 = vpack.c.bf16 %v1335_v3, %v1331_v22  ;;  %v2393_v12 = vpack.c.bf16 %v1342_v5, %v1338_v4  ;;  %v2473_v22 = vpack.c.bf16 %v1376_v58, %v1372_v57  ;;  %v1378_v3 = vld [vmem:[#allocation12 + $0x1c8] sm:$0xff]  ;;  %v1380_v5 = vld [vmem:[#allocation12 + $0x1d8] sm:$0xff] }
 0x1b6   :  { %2374 = vmatprep.subr.bf16.mxu1 %v2373_v15  ;;  %v2457_v15 = vpack.c.bf16 %v1344_v8, %v1340_v7  ;;  %v1382_v4 = vld [vmem:[#allocation12 + $0x1e8] sm:$0xff] }
 0x1b8   :  { %2120 = vmatpush1.bf16.msra.mxu0 %v2119_v21  ;;  %v2459_v21 = vpack.c.bf16 %v1343_v16, %v1339_v45  ;;  %v1383_v45 = vld [vmem:[#allocation12 + $0x1f0] sm:$0xff]  ;;  %v1390_v16 = vld [vmem:[#allocation12 + $0x228] sm:$0xff] }
 0x1b9   :  { %2376 = vmatpush1.bf16.msra.mxu1 %v2375_v23  ;;  %2122 = vmatprep.subr.bf16.mxu0 %v2121_v24  ;;  %v2397_v23 = vpack.c.bf16 %v1350_v18, %v1346_v17  ;;  %v1345_v24 = vld [vmem:[#allocation12 + $0xc0] sm:$0xff]  ;;  %v1388_v17 = vld [vmem:[#allocation12 + $0x218] sm:$0xff] }
 0x1ba   :  { %2378 = vmatprep.subr.bf16.mxu1 %v2377_v29  ;;  %v1351_v29 = vld [vmem:[#allocation12 + $0xf0] sm:$0xff]  ;;  %v2399_v34 = vpack.c.bf16 %v1349_v26, %v1345_v24  ;;  %v1392_v18 = vld [vmem:[#allocation12 + $0x238] sm:$0xff] }
 0x1bb   :  { %v1387_v24 = vld [vmem:[#allocation12 + $0x210] sm:$0xff]  ;;  %v2481_v26 = vpack.c.bf16 %v1392_v18, %v1388_v17 }
 0x1bc   :  { %2124 = vmatpush1.bf16.msra.mxu0 %v2123_v35  ;;  %v2463_v35 = vpack.c.bf16 %v1351_v29, %v1347_v27  ;;  %v1391_v27 = vld [vmem:[#allocation12 + $0x230] sm:$0xff]  ;;  %v1398_v29 = vld [vmem:[#allocation12 + $0x268] sm:$0xff] }
 0x1bd   :  { %2380 = vmatpush1.bf16.msra.mxu1 %v2379_v36  ;;  %2126 = vmatprep.subr.bf16.mxu0 %v2125_v37  ;;  %v2401_v36 = vpack.c.bf16 %v1358_v31, %v1354_v30  ;;  %v1353_v37 = vld [vmem:[#allocation12 + $0x100] sm:$0xff]  ;;  %v1396_v30 = vld [vmem:[#allocation12 + $0x258] sm:$0xff]  ;;  %v2483_v33 = vpack.c.bf16 %v1391_v27, %v1387_v24  ;;  %v1431_v24 = vld [vmem:[#allocation12 + $0x370] sm:$0xff] }
 0x1be   :  { %2382 = vmatprep.subr.bf16.mxu1 %v2381_v42  ;;  %v1359_v42 = vld [vmem:[#allocation12 + $0x130] sm:$0xff]  ;;  %v2403_v48 = vpack.c.bf16 %v1357_v38, %v1353_v37  ;;  %v1400_v31 = vld [vmem:[#allocation12 + $0x278] sm:$0xff]  ;;  %v1438_v27 = vld [vmem:[#allocation12 + $0x3a8] sm:$0xff] }
 0x1bf   :  { %v1395_v37 = vld [vmem:[#allocation12 + $0x250] sm:$0xff]  ;;  %v2485_v38 = vpack.c.bf16 %v1400_v31, %v1396_v30 }
 0x1c0   :  { %2128 = vmatpush1.bf16.msra.mxu0 %v2127_v49  ;;  %v2467_v49 = vpack.c.bf16 %v1359_v42, %v1355_v40  ;;  %v1399_v40 = vld [vmem:[#allocation12 + $0x270] sm:$0xff]  ;;  %v1406_v42 = vld [vmem:[#allocation12 + $0x2a8] sm:$0xff] }
 0x1c1   :  { %2384 = vmatpush1.bf16.msra.mxu1 %v2383_v50  ;;  %2386 = vmatprep.subr.bf16.mxu0 %v2385_v51  ;;  %v2405_v50 = vpack.c.bf16 %v1366_v44, %v1362_v43  ;;  %v1361_v51 = vld [vmem:[#allocation12 + $0x140] sm:$0xff]  ;;  %v1404_v43 = vld [vmem:[#allocation12 + $0x298] sm:$0xff]  ;;  %v2487_v47 = vpack.c.bf16 %v1399_v40, %v1395_v37  ;;  %v1439_v37 = vld [vmem:[#allocation12 + $0x3b0] sm:$0xff] }
 0x1c2   :  { %2450 = vmatprep.subr.bf16.mxu1 %v2449_v54  ;;  %v1367_v54 = vld [vmem:[#allocation12 + $0x170] sm:$0xff]  ;;  %v2407_v59 = vpack.c.bf16 %v1365_v39, %v1361_v51  ;;  %v1408_v44 = vld [vmem:[#allocation12 + $0x2b8] sm:$0xff]  ;;  %v1446_v40 = vld [vmem:[#allocation12 + $0x3e8] sm:$0xff] }
 0x1c3   :  { %1030 = vmatmul.mubr.f32.vlgmr.msra.gmra.mrb[0].mxu0 %v3090_v52  ;;  %v1403_v51 = vld [vmem:[#allocation12 + $0x290] sm:$0xff]  ;;  %v2489_v39 = vpack.c.bf16 %v1408_v44, %v1404_v43 }
 0x1c4   :  { %1314 = vmatmul.mubr.f32.vlgmr.msra.gmra.mrb[0].mxu1 %v3090_v52  ;;  %2388 = vmatpush1.bf16.msra.mxu0 %v2387_v62  ;;  %v2395_v52 = vpack.c.bf16 %v1341_v14, %v1337_v13  ;;  %v2471_v62 = vpack.c.bf16 %v1367_v54, %v1363_v53  ;;  %v1379_v13 = vld [vmem:[#allocation12 + $0x1d0] sm:$0xff]  ;;  %v1414_v54 = vld [vmem:[#allocation12 + $0x2e8] sm:$0xff] }
 0x1c5   :  { %2452 = vmatpush1.bf16.msra.mxu1 %v2451_v63  ;;  %2390 = vmatprep.subr.bf16.mxu0 %v2389_v11  ;;  %v2409_v63 = vpack.c.bf16 %v1374_v56, %v1370_v55  ;;  %v1369_v11 = vld [vmem:[#allocation12 + $0x180] sm:$0xff]  ;;  %v2479_v20 = vpack.c.bf16 %v1383_v45, %v1379_v13  ;;  %v1407_v53 = vld [vmem:[#allocation12 + $0x2b0] sm:$0xff]  ;;  %v1412_v55 = vld [vmem:[#allocation12 + $0x2d8] sm:$0xff] }
 0x1c6   :  { %2454 = vmatprep.subr.bf16.mxu1 %v2453_v2  ;;  %1546 = vmatprep.mubr.f32.mxu0 %v1479_v6  ;;  %v1375_v2 = vld [vmem:[#allocation12 + $0x1b0] sm:$0xff]  ;;  %v2411_v7 = vpack.c.bf16 %v1373_v0, %v1369_v11  ;;  %v1416_v56 = vld [vmem:[#allocation12 + $0x2f8] sm:$0xff]  ;;  %v2491_v58 = vpack.c.bf16 %v1407_v53, %v1403_v51  ;;  %v1430_v45 = vld [vmem:[#allocation12 + $0x368] sm:$0xff] }
 0x1c7   :  { %1617 = vmatprep.mubr.f32.mxu1 %v1479_v6  ;;  %v1384_v6 = vld [vmem:[#allocation12 + $0x1f8] sm:$0xff]  ;;  %v2475_v8 = vpack.c.bf16 %v1375_v2, %v1371_v1  ;;  %v1411_v11 = vld [vmem:[#allocation12 + $0x2d0] sm:$0xff]  ;;  %v2493_v0 = vpack.c.bf16 %v1416_v56, %v1412_v55  ;;  %v1422_v2 = vld [vmem:[#allocation12 + $0x328] sm:$0xff] }
 0x1c8   :  { %2392 = vmatpush1.bf16.msra.mxu0 %v2391_v9  ;;  %v2413_v9 = vpack.c.bf16 %v1382_v4, %v1378_v3  ;;  %v2477_v14 = vpack.c.bf16 %v1384_v6, %v1380_v5  ;;  %v1415_v1 = vld [vmem:[#allocation12 + $0x2f0] sm:$0xff]  ;;  %v1420_v3 = vld [vmem:[#allocation12 + $0x318] sm:$0xff]  ;;  %v1634_v53 = vld [vmem:[#allocation13 + $0x28] sm:$0xff] }
 0x1c9   :  { %2456 = vmatpush1.bf16.msra.mxu1 %v2455_v10  ;;  %2394 = vmatprep.subr.bf16.mxu0 %v2393_v12  ;;  %v1377_v10 = vld [vmem:[#allocation12 + $0x1c0] sm:$0xff]  ;;  %v1424_v4 = vld [vmem:[#allocation12 + $0x338] sm:$0xff]  ;;  %v2495_v6 = vpack.c.bf16 %v1415_v1, %v1411_v11  ;;  %v1423_v13 = vld [vmem:[#allocation12 + $0x330] sm:$0xff] }
 0x1ca   :  { %2458 = vmatprep.subr.bf16.mxu1 %v2457_v15  ;;  %v1381_v12 = vld [vmem:[#allocation12 + $0x1e0] sm:$0xff]  ;;  %v1386_v15 = vld [vmem:[#allocation12 + $0x208] sm:$0xff]  ;;  %v1447_v51 = vld [vmem:[#allocation12 + $0x3f0] sm:$0xff] }
 0x1cb   :  { %v2415_v19 = vpack.c.bf16 %v1381_v12, %v1377_v10  ;;  %v1419_v10 = vld [vmem:[#allocation12 + $0x310] sm:$0xff]  ;;  %v2497_v12 = vpack.c.bf16 %v1424_v4, %v1420_v3  ;;  %v1642_v1 = vld [vmem:[#allocation13 + $0x68] sm:$0xff] }
 0x1cc   :  { %2396 = vmatpush1.bf16.msra.mxu0 %v2395_v52  ;;  %v2417_v52 = vpack.c.bf16 %v1390_v16, %v1386_v15  ;;  %v1428_v15 = vld [vmem:[#allocation12 + $0x358] sm:$0xff]  ;;  %v2499_v18 = vpack.c.bf16 %v1423_v13, %v1419_v10  ;;  %v1635_v11 = vld [vmem:[#allocation13 + $0x30] sm:$0xff] }
 0x1cd   :  { %2460 = vmatpush1.bf16.msra.mxu1 %v2459_v21  ;;  %2398 = vmatprep.subr.bf16.mxu0 %v2397_v23  ;;  %v1385_v21 = vld [vmem:[#allocation12 + $0x200] sm:$0xff]  ;;  %v1432_v16 = vld [vmem:[#allocation12 + $0x378] sm:$0xff]  ;;  %v1643_v10 = vld [vmem:[#allocation13 + $0x70] sm:$0xff] }
 0x1ce   :  { %2462 = vmatprep.subr.bf16.mxu1 %v2461_v28  ;;  %v1389_v23 = vld [vmem:[#allocation12 + $0x220] sm:$0xff]  ;;  %v1394_v28 = vld [vmem:[#allocation12 + $0x248] sm:$0xff] }
 0x1cf   :  { %v2419_v32 = vpack.c.bf16 %v1389_v23, %v1385_v21  ;;  %v1427_v21 = vld [vmem:[#allocation12 + $0x350] sm:$0xff]  ;;  %v2501_v23 = vpack.c.bf16 %v1432_v16, %v1428_v15  ;;  %v1648_v15 = vld [vmem:[#allocation13 + $0x98] sm:$0xff]  ;;  %v1645_v16 = vld [vmem:[#allocation13 + $0x80] sm:$0xff] }
 0x1d0   :  { %2400 = vmatpush1.bf16.msra.mxu0 %v2399_v34  ;;  %v2421_v34 = vpack.c.bf16 %v1398_v29, %v1394_v28  ;;  %v1436_v28 = vld [vmem:[#allocation12 + $0x398] sm:$0xff]  ;;  %v2503_v31 = vpack.c.bf16 %v1431_v24, %v1427_v21  ;;  %v690_v21 = vsub.s32 0, %v3055_v61  ;;  %v698_v24 = vsub.s32 2, %v3055_v61 }
 0x1d1   :  { %2464 = vmatpush1.bf16.msra.mxu1 %v2463_v35  ;;  %2402 = vmatprep.subr.bf16.mxu0 %v2401_v36  ;;  %v1393_v35 = vld [vmem:[#allocation12 + $0x240] sm:$0xff]  ;;  %v1440_v29 = vld [vmem:[#allocation12 + $0x3b8] sm:$0xff] }
 0x1d2   :  { %2466 = vmatprep.subr.bf16.mxu1 %v2465_v41  ;;  %v1397_v36 = vld [vmem:[#allocation12 + $0x260] sm:$0xff]  ;;  %v1402_v41 = vld [vmem:[#allocation12 + $0x288] sm:$0xff] }
 0x1d3   :  { %v2423_v46 = vpack.c.bf16 %v1397_v36, %v1393_v35  ;;  %v1435_v35 = vld [vmem:[#allocation12 + $0x390] sm:$0xff]  ;;  %v2505_v36 = vpack.c.bf16 %v1440_v29, %v1436_v28  ;;  %v702_v28 = vsub.s32 3, %v3055_v61 }
 0x1d4   :  { %2404 = vmatpush1.bf16.msra.mxu0 %v2403_v48  ;;  %v2425_v48 = vpack.c.bf16 %v1406_v42, %v1402_v41  ;;  %v1444_v41 = vld [vmem:[#allocation12 + $0x3d8] sm:$0xff]  ;;  %v2507_v44 = vpack.c.bf16 %v1439_v37, %v1435_v35 }
 0x1d5   :  { %2468 = vmatpush1.bf16.msra.mxu1 %v2467_v49  ;;  %2406 = vmatprep.subr.bf16.mxu0 %v2405_v50  ;;  %v1401_v49 = vld [vmem:[#allocation12 + $0x280] sm:$0xff]  ;;  %v1448_v42 = vld [vmem:[#allocation12 + $0x3f8] sm:$0xff] }
 0x1d6   :  { %2470 = vmatprep.subr.bf16.mxu1 %v2469_v25  ;;  %v1405_v50 = vld [vmem:[#allocation12 + $0x2a0] sm:$0xff]  ;;  %v1410_v25 = vld [vmem:[#allocation12 + $0x2c8] sm:$0xff] }
 0x1d7   :  { %v2427_v57 = vpack.c.bf16 %v1405_v50, %v1401_v49  ;;  %v1443_v49 = vld [vmem:[#allocation12 + $0x3d0] sm:$0xff]  ;;  %v2509_v50 = vpack.c.bf16 %v1448_v42, %v1444_v41 }
 0x1d8   :  { %2408 = vmatpush1.bf16.msra.mxu0 %v2407_v59  ;;  %v2429_v59 = vpack.c.bf16 %v1414_v54, %v1410_v25  ;;  %v1632_v25 = vld [vmem:[#allocation13 + $0x18] sm:$0xff]  ;;  %v2511_v56 = vpack.c.bf16 %v1447_v51, %v1443_v49 }
 0x1d9   :  { %2472 = vmatpush1.bf16.msra.mxu1 %v2471_v62  ;;  %2410 = vmatprep.subr.bf16.mxu0 %v2409_v63  ;;  %v1409_v62 = vld [vmem:[#allocation12 + $0x2c0] sm:$0xff]  ;;  %v1636_v54 = vld [vmem:[#allocation13 + $0x38] sm:$0xff] }
 0x1da   :  { %2474 = vmatprep.subr.bf16.mxu1 %v2473_v22  ;;  %v1413_v63 = vld [vmem:[#allocation12 + $0x2e0] sm:$0xff]  ;;  %v1418_v22 = vld [vmem:[#allocation12 + $0x308] sm:$0xff] }
 0x1db   :  { %v2431_v5 = vpack.c.bf16 %v1413_v63, %v1409_v62  ;;  %v1631_v62 = vld [vmem:[#allocation13 + $0x10] sm:$0xff]  ;;  %v2521_v63 = vpack.c.bf16 %v1636_v54, %v1632_v25 }
 0x1dc   :  { %2412 = vmatpush1.bf16.msra.mxu0 %v2411_v7  ;;  %v2433_v7 = vpack.c.bf16 %v1422_v2, %v1418_v22  ;;  %v1640_v22 = vld [vmem:[#allocation13 + $0x58] sm:$0xff]  ;;  %v2523_v4 = vpack.c.bf16 %v1635_v11, %v1631_v62  ;;  %v1822_v11 = vstv %s1821_s10 }
 0x1dd   :  { %2476 = vmatpush1.bf16.msra.mxu1 %v2475_v8  ;;  %2414 = vmatprep.subr.bf16.mxu0 %v2413_v9  ;;  %v1417_v8 = vld [vmem:[#allocation12 + $0x300] sm:$0xff]  ;;  %v1644_v2 = vld [vmem:[#allocation13 + $0x78] sm:$0xff] }
 0x1de   :  { %2478 = vmatprep.subr.bf16.mxu1 %v2477_v14  ;;  %v1421_v9 = vld [vmem:[#allocation12 + $0x320] sm:$0xff]  ;;  %v1426_v14 = vld [vmem:[#allocation12 + $0x348] sm:$0xff] }
 0x1df   :  { %v2435_v17 = vpack.c.bf16 %v1421_v9, %v1417_v8  ;;  %v2525_v8 = vpack.c.bf16 %v1644_v2, %v1640_v22  ;;  %v1639_v9 = vld [vmem:[#allocation13 + $0x50] sm:$0xff] }
 0x1e0   :  { %2416 = vmatpush1.bf16.msra.mxu0 %v2415_v19  ;;  %v2437_v19 = vpack.c.bf16 %v1430_v45, %v1426_v14  ;;  %v2527_v13 = vpack.c.bf16 %v1643_v10, %v1639_v9  ;;  %v1646_v14 = vld [vmem:[#allocation13 + $0x88] sm:$0xff]  ;;  %v2845_v45 = vmov 0.0  }
 0x1e1   :  { %2480 = vmatpush1.bf16.msra.mxu1 %v2479_v20  ;;  %2418 = vmatprep.subr.bf16.mxu0 %v2417_v52  ;;  %v1425_v20 = vld [vmem:[#allocation12 + $0x340] sm:$0xff] }
 0x1e2   :  { %2482 = vmatprep.subr.bf16.mxu1 %v2481_v26  ;;  %v1429_v52 = vld [vmem:[#allocation12 + $0x360] sm:$0xff]  ;;  %v1434_v26 = vld [vmem:[#allocation12 + $0x388] sm:$0xff] }
 0x1e3   :  { %v2439_v30 = vpack.c.bf16 %v1429_v52, %v1425_v20 }
 0x1e4   :  { %2420 = vmatpush1.bf16.msra.mxu0 %v2419_v32  ;;  %v2441_v32 = vpack.c.bf16 %v1438_v27, %v1434_v26  ;;  %v694_v26 = vsub.s32 1, %v3055_v61  ;;  %v1449_v27 = vld [vmem:[#allocation16] sm:$0xf] }
 0x1e5   :  { %2484 = vmatpush1.bf16.msra.mxu1 %v2483_v33  ;;  %2422 = vmatprep.subr.bf16.mxu0 %v2421_v34  ;;  %v1433_v33 = vld [vmem:[#allocation12 + $0x380] sm:$0xff] }
 0x1e6   :  { %2486 = vmatprep.subr.bf16.mxu1 %v2485_v38  ;;  %v1437_v34 = vld [vmem:[#allocation12 + $0x3a0] sm:$0xff]  ;;  %v1442_v38 = vld [vmem:[#allocation12 + $0x3c8] sm:$0xff] }
 0x1e7   :  { %v2443_v43 = vpack.c.bf16 %v1437_v34, %v1433_v33  ;;  %v1462_v33 = vrot.slane %v1449_v27, %v698_v24  ;;  %v1458_v34 = vrot.slane %v1449_v27, %v694_v26 }
 0x1e8   :  { %2424 = vmatpush1.bf16.msra.mxu0 %v2423_v46  ;;  %v2445_v46 = vpack.c.bf16 %v1446_v40, %v1442_v38 }
 0x1e9   :  { %2488 = vmatpush1.bf16.msra.mxu1 %v2487_v47  ;;  %2426 = vmatprep.subr.bf16.mxu0 %v2425_v48  ;;  %v1441_v47 = vld [vmem:[#allocation12 + $0x3c0] sm:$0xff] }
 0x1ea   :  { %2490 = vmatprep.subr.bf16.mxu1 %v2489_v39  ;;  %v1445_v48 = vld [vmem:[#allocation12 + $0x3e0] sm:$0xff]  ;;  %v1630_v39 = vld [vmem:[#allocation13 + $0x8] sm:$0xff] }
 0x1eb   :  { %v2447_v55 = vpack.c.bf16 %v1445_v48, %v1441_v47 }
 0x1ec   :  { %2428 = vmatpush1.bf16.msra.mxu0 %v2427_v57  ;;  %v2513_v57 = vpack.c.bf16 %v1634_v53, %v1630_v39  ;;  %v1649_v53 = vld [vmem:[#allocation18] sm:$0xf] }
 0x1ed   :  { %2492 = vmatpush1.bf16.msra.mxu1 %v2491_v58  ;;  %2430 = vmatprep.subr.bf16.mxu0 %v2429_v59  ;;  %v1629_v58 = vld [vmem:[#allocation13] sm:$0xff]  ;;  %v1654_v54 = vrot.slane %v1649_v53, %v690_v21 }
 0x1ee   :  { %2494 = vmatprep.subr.bf16.mxu1 %v2493_v0  ;;  %v1633_v59 = vld [vmem:[#allocation13 + $0x20] sm:$0xff]  ;;  %v1638_v0 = vld [vmem:[#allocation13 + $0x48] sm:$0xff] }
 0x1ef   :  { %v2515_v3 = vpack.c.bf16 %v1633_v59, %v1629_v58 }
 0x1f0   :  { %2432 = vmatpush1.bf16.msra.mxu0 %v2431_v5  ;;  %v2517_v5 = vpack.c.bf16 %v1642_v1, %v1638_v0 }
 0x1f1   :  { %2496 = vmatpush1.bf16.msra.mxu1 %v2495_v6  ;;  %2434 = vmatprep.subr.bf16.mxu0 %v2433_v7  ;;  %v1637_v6 = vld [vmem:[#allocation13 + $0x40] sm:$0xff] }
 0x1f2   :  { %2498 = vmatprep.subr.bf16.mxu1 %v2497_v12  ;;  %v1641_v7 = vld [vmem:[#allocation13 + $0x60] sm:$0xff] }
 0x1f3   :  { %v2519_v12 = vpack.c.bf16 %v1641_v7, %v1637_v6 }
 0x1f4   :  { %2436 = vmatpush1.bf16.msra.mxu0 %v2435_v17  ;;  %v1647_v17 = vld [vmem:[#allocation13 + $0x90] sm:$0xff] }
 0x1f5   :  { %2500 = vmatpush1.bf16.msra.mxu1 %v2499_v18  ;;  %2438 = vmatprep.subr.bf16.mxu0 %v2437_v19  ;;  %v1628_v18 = vld [vmem:[#allocation9] sm:$0x3] }
 0x1f6   :  { %2502 = vmatprep.subr.bf16.mxu1 %v2501_v23  ;;  %v686_v23 = vld [vmem:[#allocation15] sm:$0xf] }
 0x1f7   :  { %v691_v29 = vrot.slane %v686_v23, %v690_v21  ;;  %v703_v35 = vrot.slane %v686_v23, %v702_v28 }
 0x1f8   :  { %2440 = vmatpush1.bf16.msra.mxu0 %v2439_v30  ;;  %v1454_v30 = vrot.slane %v1449_v27, %v690_v21 }
 0x1f9   :  { %2504 = vmatpush1.bf16.msra.mxu1 %v2503_v31  ;;  %2442 = vmatprep.subr.bf16.mxu0 %v2441_v32  ;;  %v699_v31 = vrot.slane %v686_v23, %v698_v24  ;;  %v695_v32 = vrot.slane %v686_v23, %v694_v26 }
 0x1fa   :  { %2506 = vmatprep.subr.bf16.mxu1 %v2505_v36  ;;  %v1466_v36 = vrot.slane %v1449_v27, %v702_v28 }
 0x1fc   :  { %2444 = vmatpush1.bf16.msra.mxu0 %v2443_v43 }
 0x1fd   :  { %2508 = vmatpush1.bf16.msra.mxu1 %v2507_v44  ;;  %2446 = vmatprep.subr.bf16.mxu0 %v2445_v46 }
 0x1fe   :  { %2510 = vmatprep.subr.bf16.mxu1 %v2509_v50 }
 0x200   :  { %2448 = vmatpush1.bf16.msra.mxu0 %v2447_v55  ;;  %v1662_v55 = vrot.slane %v1649_v53, %v698_v24 }
 0x201   :  { %2512 = vmatpush1.bf16.msra.mxu1 %v2511_v56  ;;  %2514 = vmatprep.subr.bf16.mxu0 %v2513_v57  ;;  %v1658_v56 = vrot.slane %v1649_v53, %v694_v26  ;;  %v1666_v57 = vrot.slane %v1649_v53, %v702_v28 }
 0x202   :  { %2522 = vmatprep.subr.bf16.mxu1 %v2521_v63 }
 0x203   :  { %1547 = vmatmul.mubr.f32.vlgmr.msra.gmra.mrb[2].mxu0 %v3096_v60 }
 0x204   :  { %1618 = vmatmul.mubr.f32.vlgmr.msra.gmra.mrb[2].mxu1 %v3096_v60  ;;  %2516 = vmatpush1.bf16.msra.mxu0 %v2515_v3  ;;  %v1825_v3 = vstv %s1869_s16 }
 0x205   :  { %2524 = vmatpush1.bf16.msra.mxu1 %v2523_v4  ;;  %2518 = vmatprep.subr.bf16.mxu0 %v2517_v5 }
 0x206   :  { %2526 = vmatprep.subr.bf16.mxu1 %v2525_v8  ;;  %1739 = vmatprep.mubr.f32.mxu0 %v2845_v45  ;;  %v1829_v8 = vstv %s1870_s17 }
 0x207   :  { %1810 = vmatprep.mubr.f32.mxu1 %v2845_v45 }
 0x208   :  { %2520 = vmatpush1.bf16.msra.mxu0 %v2519_v12  ;;  %v1833_v12 = vstv %s1871_s5 }
 0x209   :  { %2528 = vmatpush1.bf16.msra.mxu1 %v2527_v13  ;;  %1683 = vmatprep.subr.mxu0 %v1646_v14 }
 0x20a   :  { %1754 = vmatprep.subr.mxu1 %v1648_v15 }
 0x20c   :  { %1684 = vmatpush1.msra.mxu0 %v1645_v16  ;;  %v1872_v16 = vld [vmem:[#allocation19] ss:$0 sm:$0xff] }
 0x20d   :  { %1755 = vmatpush1.msra.mxu1 %v1647_v17  ;;  %1867 = vmatmul.mubr.msk.f32.vlgmr.msra.gmra.mrb[4].mxu0 %vm1671_vm0, %v1628_v18 }
 0x20e   :  { %1868 = vmatmul.mubr.msk.f32.vlgmr.msra.gmra.mrb[4].mxu1 %vm1671_vm0, %v1628_v18 }
 0x296   :  { %v1031_v60 = vpop.f32.mrb[0].mxu0 }
 0x297   :  { %v1315_v19 = vpop.f32.mrb[0].mxu1  ;;  %v1033_v20 = vpop.f32.mrb[1].mxu0  ;;  %v2529_v38 = vadd.f32 %v1031_v60, %v691_v29 }
 0x298   :  { %v1317_v52 = vpop.f32.mrb[1].mxu1  ;;  %v2531_v43 = vadd.f32 %v1315_v19, %v699_v31  ;;  %v2530_v44 = vadd.f32 %v1033_v20, %v695_v32 }
 0x299   :  { %v2532_v49 = vadd.f32 %v1317_v52, %v703_v35 }
 0x2d6   :  { %v1548_v37 = vpop.f32.mrb[2].mxu0 }
 0x2d7   :  { %v1549_v40 = vadd.f32 %v1548_v37, %v1454_v30  ;;  %v1619_v41 = vpop.f32.mrb[2].mxu1  ;;  %v1550_v42 = vpop.f32.mrb[3].mxu0 }
 0x2d8   :  { %v1620_v46 = vadd.f32 %v1619_v41, %v1462_v33  ;;  %v1551_v47 = vadd.f32 %v1550_v42, %v1458_v34  ;;  %v1621_v48 = vpop.f32.mrb[3].mxu1 }
 0x2d9   :  { %v1624_v61 = vmul.f32 %v2529_v38, %v1549_v40  ;;  %v1622_v50 = vadd.f32 %v1621_v48, %v1466_v36 }
 0x2da   :  { %v1626_v51 = vmul.f32 %v2531_v43, %v1620_v46  ;;  %v1625_v39 = vmul.f32 %v2530_v44, %v1551_v47 }
 0x2db   :  { %v1627_v25 = vmul.f32 %v2532_v49, %v1622_v50 }
 0x2e0   :  { %v1741_v58 = vpop.f32.mrb[4].mxu0 }
 0x2e1   :  { %v1742_v59 = vadd.f32 %v1741_v58, %v1654_v54  ;;  %v1812_v62 = vpop.f32.mrb[4].mxu1  ;;  %v1743_v63 = vpop.f32.mrb[5].mxu0 }
 0x2e2   :  { %v1813_v0 = vadd.f32 %v1812_v62, %v1662_v55  ;;  %v1744_v1 = vadd.f32 %v1743_v63, %v1658_v56  ;;  %v1814_v22 = vpop.f32.mrb[5].mxu1 }
 0x2e3   :  { %v1817_v2 = vmul.f32 %v1742_v59, %v1624_v61  ;;  %v1815_v4 = vadd.f32 %v1814_v22, %v1666_v57 }
 0x2e4   :  { %v1819_v5 = vmul.f32 %v1813_v0, %v1626_v51  ;;  %v1818_v6 = vmul.f32 %v1744_v1, %v1625_v39 }
 0x2e5   :  { %v1823_v7 = vmul.f32 %v1822_v11, %v1817_v2  ;;  %v1820_v9 = vmul.f32 %v1815_v4, %v1627_v25 }
 0x2e6   :  { %v1826_v10 = vmul.f32 %v1825_v3, %v1818_v6  ;;  %v1830_v13 = vmul.f32 %v1829_v8, %v1819_v5 }
 0x2e7   :  { %v1834_v45 = vmul.f32 %v1833_v12, %v1820_v9 }
 0x2e8   :  { %v1827_v14 = vadd.f32 %v1826_v10, %v1823_v7 }
 0x2ea   :  { %v1831_v15 = vadd.f32 %v1830_v13, %v1827_v14 }
 0x2ec   :  { %v1835_v17 = vadd.f32 %v1834_v45, %v1831_v15 }
 0x2ee   :  { %v1843_v18 = vadd.f32 %v1872_v16, %v1835_v17 }
 0x2f0   :  { %1844 = vst [vmem:[#allocation21] sm:$0x3] %v1843_v18 }
 0x2f1   :  { %2804 = shalt.err (!%p2801_p3)
}
 0x2f2   :  { %s2805_s19 = scalar_lea.hbm %s3131_s11, 32 }
 0x2f3   :  { %p2806_p4 = scmp.ne.s32.totalorder %s3131_s11, %s2805_s19  ;;  %p2809_p5 = scmp.lt.u32.totalorder %s2805_s19, %s3131_s11 }
 0x2f5   :  { %p2811_p6 = pnand %p2809_p5, %p2806_p4 }
 0x2f7   :  { %2814 = shalt.err (!%p2811_p6)
}
 0x2f8   :  { %1854 = dma.vmem_to_hbm [thread:$0]  %s1852_s18, 32, %s3131_s11, [#allocation4]  }
 0x2f9   :  { %2829 = dma.done.wait [#allocation4], 32  }
 0x2fa   :  { %2830 = vsyncadd [#allocation4], 4294967264 }
 0x2fb   :  { %1858 = vsyncpa [#allocation3], 1 }
 0x2fc   :  { %1859 = vsyncpa [#allocation8], 1 }
 0x2fd   :  { %1860 = vsyncpa [#allocation11], 1 }
 0x2fe   :  { %1861 = vsyncpa [#allocation14], 1 }
 0x2ff   :  { %1862 = vsyncpa [#allocation17], 1 }
 0x300   :  { %1863 = vsyncpa [#allocation20], 1 }
 0x301   :  { %1864 = vsyncpa [#allocation4], 1 }
 0x302   :  { %1865 = vsyncpa [#allocation5], 1 }

</bundles_post_ra>
